<compile_context>
chip_gen: v7x
topology: tpu7x:2x2x1
jax: 0.10.0
libtpu: 0.0.40
codegen_flags: <defaults>
</compile_context>

<pallas_src>
import math
import functools

import jax
import jax.numpy as jnp
from jax.experimental import pallas as pl
from jax.experimental.pallas import tpu as pltpu


# --------------------------------------------------------------------------------------
# Producer: K/V projection, written to HBM in x-major and y-major bf16 layouts.
# --------------------------------------------------------------------------------------
def _project_kv_kernel(k_ref, v_ref, wk_ref, wv_ref,
                       kx_ref, ky_ref, vx_ref, vy_ref):
    tp, N, D = k_ref.shape[1], k_ref.shape[2], k_ref.shape[3]
    kp = jnp.dot(k_ref[0].reshape(tp * N, D), wk_ref[...],
                 preferred_element_type=jnp.float32)
    vp = jnp.dot(v_ref[0].reshape(tp * N, D), wv_ref[...],
                 preferred_element_type=jnp.float32)
    kp = kp.reshape(tp, N, D).astype(jnp.bfloat16)
    vp = vp.reshape(tp, N, D).astype(jnp.bfloat16)
    kx_ref[0] = kp                                   # k_proj[x, z, d]  (x-major)
    vx_ref[0] = vp
    # cast to bf16 BEFORE the transpose: half the vregs through the XLU.
    ky_ref[0] = jnp.transpose(kp, (1, 0, 2))         # k_proj[z, y, d] stored y-major
    vy_ref[0] = jnp.transpose(vp, (1, 0, 2))


def _project_kv(key_bf, value_bf, wk_bf, wv_bf, *, tp):
    B, N, _, D = key_bf.shape
    grid_spec = pltpu.PrefetchScalarGridSpec(
        num_scalar_prefetch=0,
        grid=(B, N // tp),
        in_specs=[
            pl.BlockSpec((1, tp, N, D), lambda b, i: (b, i, 0, 0)),   # key tile
            pl.BlockSpec((1, tp, N, D), lambda b, i: (b, i, 0, 0)),   # value tile
            pl.BlockSpec((D, D), lambda b, i: (0, 0)),                # wk (= Wk.T, bf16)
            pl.BlockSpec((D, D), lambda b, i: (0, 0)),                # wv (= Wv.T, bf16)
        ],
        out_specs=[
            pl.BlockSpec((1, tp, N, D), lambda b, i: (b, i, 0, 0)),   # k_proj x-major
            pl.BlockSpec((1, N, tp, D), lambda b, i: (b, 0, i, 0)),   # k_proj y-major
            pl.BlockSpec((1, tp, N, D), lambda b, i: (b, i, 0, 0)),   # v_proj x-major
            pl.BlockSpec((1, N, tp, D), lambda b, i: (b, 0, i, 0)),   # v_proj y-major
        ],
    )
    out_shape = tuple(jax.ShapeDtypeStruct((B, N, N, D), jnp.bfloat16) for _ in range(4))
    return pl.pallas_call(
        _project_kv_kernel,
        out_shape=out_shape,
        grid_spec=grid_spec,
        compiler_params=pltpu.CompilerParams(
            dimension_semantics=("parallel", "parallel"),
            vmem_limit_bytes=48 * 1024 * 1024,
        ),
    )(key_bf, value_bf, wk_bf, wv_bf)


# --------------------------------------------------------------------------------------
# Main attention kernel: per (batch, x-tile), online joint right/left softmax.
# --------------------------------------------------------------------------------------
def _edge_attention_kernel(q_ref, mask_ref, kx_ref, ky_ref, vx_ref, vy_ref,
                           wq_ref, wo_ref, out_ref, *, num_heads):
    tx, N, D = q_ref.shape[1], q_ref.shape[2], q_ref.shape[3]
    d_k = D // num_heads

    # ---- q projection for this x tile (1/sqrt(d_k) already folded into wq on the host) ----
    qf = jnp.dot(q_ref[0].reshape(tx * N, D), wq_ref[...],
                 preferred_element_type=jnp.float32).reshape(tx, N, D)
    q_x = qf.astype(jnp.bfloat16)                         # q[x, y, d]
    q_y = jnp.transpose(q_x, (1, 0, 2))                   # q[y, x, d]  (bf16 transpose)

    # additive mask bias (shared across heads): 0 visible, -1e30 masked.
    m_i8 = mask_ref[0]                                     # (tx, N, N) int8
    bias = jnp.where(m_i8 != 0, jnp.float32(-1e30), jnp.float32(0.0))
    # transpose the int8 mask (1/4 the vregs through the XLU vs transposing the fp32 bias)
    bias_t = jnp.where(jnp.transpose(m_i8, (1, 0, 2)) != 0,
                       jnp.float32(-1e30), jnp.float32(0.0))

    kx = kx_ref[0]       # (tx, N, D) bf16 : k_proj[x, z, d] for this x tile
    vx = vx_ref[0]
    ky = ky_ref[0]       # (N, N, D)  bf16 : k_proj y-major -> indexed [y, z, d]
    vy = vy_ref[0]
    wo_all = wo_ref[...]                                   # (H, d_k, D) bf16

    acc = jnp.zeros((tx * N, D), jnp.float32)

    # TODO(synk): attention dropout omitted (eval-mode identity; no in-kernel RNG dropout).
    # TODO(synk): for production d_model (d_k < 128) process heads in groups of G with
    #             G*d_k a multiple of 128 so the per-head lane slices are lane-dense.
    # TODO(synk): for very large N on v7x, tile the z (context) axis flash-style instead of
    #             keeping the full y-major k/v block resident, and bit-pack the mask 8:1.
    for h in range(num_heads):
        sl = slice(h * d_k, (h + 1) * d_k)
        q_hx, q_hy = q_x[:, :, sl], q_y[:, :, sl]
        k_hx, k_hy = kx[:, :, sl], ky[:, :, sl]
        v_hx, v_hy = vx[:, :, sl], vy[:, :, sl]

        # right path: s_r[x, y, z] = sum_d q[x,y,d] * k[x,z,d]    (batch x leading)
        s_r = jnp.einsum('xyd,xzd->xyz', q_hx, k_hx,
                         preferred_element_type=jnp.float32) + bias
        # left path computed y-major: s_lt[y, x, z] = sum_d q[x,y,d] * k[z,y,d]
        s_lt = jnp.einsum('yxd,yzd->yxz', q_hy, k_hy,
                          preferred_element_type=jnp.float32) + bias_t

        # joint softmax over the concatenated (right | left) z axis, done online
        m_r = jnp.max(s_r, axis=2, keepdims=True)                              # (tx, N, 1)
        m_l = jnp.transpose(jnp.max(s_lt, axis=2, keepdims=True), (1, 0, 2))   # (tx, N, 1)
        m = jnp.maximum(m_r, m_l)
        m_t = jnp.transpose(m, (1, 0, 2))                                      # (N, tx, 1)
        e_r = jnp.exp(s_r - m)
        e_lt = jnp.exp(s_lt - m_t)
        denom = (jnp.sum(e_r, axis=2, keepdims=True)
                 + jnp.transpose(jnp.sum(e_lt, axis=2, keepdims=True), (1, 0, 2)))
        inv = pl.reciprocal(denom, approx=True)                                # EUP slot
        inv_t = jnp.transpose(inv, (1, 0, 2))
        a_r = (e_r * inv).astype(jnp.bfloat16)
        a_lt = (e_lt * inv_t).astype(jnp.bfloat16)

        # x_r[x,y,d] = sum_z a_r[x,y,z] * v[x,z,d]
        x_r = jnp.einsum('xyz,xzd->xyd', a_r, v_hx,
                         preferred_element_type=jnp.float32)
        # x_l[x,y,d] = sum_z a_l[x,y,z] * v[z,y,d]   (computed y-major, transposed back)
        x_lt = jnp.einsum('yxz,yzd->yxd', a_lt, v_hy,
                          preferred_element_type=jnp.float32)
        x_h = x_r + jnp.transpose(x_lt, (1, 0, 2))                             # (tx, N, d_k)

        # per-head output projection accumulation (no output slab / partial-lane stores)
        acc = acc + jnp.dot(x_h.reshape(tx * N, d_k).astype(jnp.bfloat16),
                            wo_all[h], preferred_element_type=jnp.float32)

    out_ref[0] = acc.reshape(tx, N, D).astype(out_ref.dtype)


def edge_attention_flat(query, key, value, mask, wk, wv, wq, wo, *,
                        num_heads, tx=None, tp=None):
    B, N, _, D = query.shape
    d_k = D // num_heads
    if tx is None:
        tx = N
        for cand in (64, 32, 16, 8):
            if N % cand == 0 and N > cand:
                tx = cand
                break
    assert N % tx == 0, "x-tile size must divide the number of nodes"
    if tp is None:
        tp = N
        for cand in (64, 32, 16):
            if N % cand == 0 and N > cand:
                tp = cand
                break
    assert N % tp == 0, "projection tile size must divide the number of nodes"

    # bf16 everywhere the MXU touches (fp32 accumulation inside the kernels); fold the
    # 1/sqrt(d_k) scale into Wq on the host; mask is the only non-bf16 tensor (int8).
    q_bf = query.astype(jnp.bfloat16)
    k_bf = key.astype(jnp.bfloat16)
    v_bf = value.astype(jnp.bfloat16)
    wk_bf = wk.astype(jnp.bfloat16)
    wv_bf = wv.astype(jnp.bfloat16)
    wq_bf = (wq * (1.0 / math.sqrt(d_k))).astype(jnp.bfloat16)
    wo_h = wo.reshape(num_heads, d_k, D).astype(jnp.bfloat16)
    mask_i8 = mask.astype(jnp.int8)

    # ---- producer pass: bf16 K/V projections in x-major and y-major layouts ----
    k_x, k_y, v_x, v_y = _project_kv(k_bf, v_bf, wk_bf, wv_bf, tp=tp)

    kernel = functools.partial(_edge_attention_kernel, num_heads=num_heads)
    grid_spec = pltpu.PrefetchScalarGridSpec(
        num_scalar_prefetch=0,
        grid=(B, N // tx),
        in_specs=[
            pl.BlockSpec((1, tx, N, D), lambda b, x: (b, x, 0, 0)),       # q tile
            pl.BlockSpec((1, tx, N, N), lambda b, x: (b, x, 0, 0)),       # mask tile (int8)
            pl.BlockSpec((1, tx, N, D), lambda b, x: (b, x, 0, 0)),       # k_proj x-major tile
            pl.BlockSpec((1, N, N, D), lambda b, x: (b, 0, 0, 0)),        # k_proj y-major (per batch)
            pl.BlockSpec((1, tx, N, D), lambda b, x: (b, x, 0, 0)),       # v_proj x-major tile
            pl.BlockSpec((1, N, N, D), lambda b, x: (b, 0, 0, 0)),        # v_proj y-major (per batch)
            pl.BlockSpec((D, D), lambda b, x: (0, 0)),                    # wq (scaled, bf16)
            pl.BlockSpec((num_heads, d_k, D), lambda b, x: (0, 0, 0)),    # wo split per head
        ],
        out_specs=pl.BlockSpec((1, tx, N, D), lambda b, x: (b, x, 0, 0)),
    )
    return pl.pallas_call(
        kernel,
        out_shape=jax.ShapeDtypeStruct((B, N, N, D), jnp.float32),
        grid_spec=grid_spec,
        compiler_params=pltpu.CompilerParams(
            dimension_semantics=("parallel", "parallel"),
            vmem_limit_bytes=48 * 1024 * 1024,
        ),
    )(q_bf, mask_i8, k_x, k_y, v_x, v_y, wq_bf, wo_h)


def reference(query, key, value, mask, wk, wv, wq, wo, *, num_heads):
    """Pure-JAX fp32 mirror of the PyTorch forward (dropout in eval mode)."""
    B, N, _, D = query.shape
    d_k = D // num_heads
    k = (key.reshape(B, N * N, D) @ wk).reshape(B, N, N, num_heads, d_k)
    v = (value.reshape(B, N * N, D) @ wv).reshape(B, N, N, num_heads, d_k)
    q = (query.reshape(B, N * N, D) @ wq).reshape(B, N, N, num_heads, d_k)
    scores_r = jnp.einsum('bxyhd,bxzhd->bxyzh', q, k) / math.sqrt(d_k)
    scores_l = jnp.einsum('bxyhd,bzyhd->bxyzh', q, k) / math.sqrt(d_k)
    m = mask[..., None]
    scores_r = jnp.where(m, -jnp.inf, scores_r)
    scores_l = jnp.where(m, -jnp.inf, scores_l)
    scores = jnp.concatenate([scores_r, scores_l], axis=3)
    att = jax.nn.softmax(scores, axis=3)
    att_r, att_l = att[:, :, :, :N, :], att[:, :, :, N:, :]
    x_r = jnp.einsum('bxyzh,bxzhd->bxyhd', att_r, v)
    x_l = jnp.einsum('bxyzh,bzyhd->bxyhd', att_l, v)
    x = (x_r + x_l).reshape(B, N * N, D)
    return (x @ wo).reshape(B, N, N, D)


if __name__ == "__main__":
    B, N, D, H = 2, 16, 32, 4
    key0 = jax.random.PRNGKey(0)
    ks = jax.random.split(key0, 8)
    query = jax.random.normal(ks[0], (B, N, N, D), jnp.float32)
    key_in = jax.random.normal(ks[1], (B, N, N, D), jnp.float32)
    value = jax.random.normal(ks[2], (B, N, N, D), jnp.float32)
    wscale = 1.0 / math.sqrt(D)
    wk = jax.random.normal(ks[3], (D, D), jnp.float32) * wscale
    wv = jax.random.normal(ks[4], (D, D), jnp.float32) * wscale
    wq = jax.random.normal(ks[5], (D, D), jnp.float32) * wscale
    wo = jax.random.normal(ks[6], (D, D), jnp.float32) * wscale
    mask = jax.random.bernoulli(ks[7], 0.3, (B, N, N, N))
    mask = mask.at[..., 0].set(False)   # keep >=1 unmasked position per (x, y) row

    out = edge_attention_flat(query, key_in, value, mask, wk, wv, wq, wo,
                              num_heads=H, tx=8, tp=16)
    out = jax.block_until_ready(out)

    ref = reference(query, key_in, value, mask, wk, wv, wq, wo, num_heads=H)
    # Kernel runs with bf16 inputs/weights/MXU operands (fp32 accumulation) vs. the fp32
    # reference, so the tolerance is relaxed accordingly.
    if not jnp.allclose(out, ref, atol=2e-1, rtol=2e-1):
        raise AssertionError(
            "mismatch vs reference, max abs diff = %e"
            % float(jnp.max(jnp.abs(out - ref))))
    print("KERNEL_OK")
</pallas_src>

<mosaic_0001>
module attributes {stable_mosaic.version = 11 : i64} {
  func.func @_project_kv_kernel(%arg0: i32, %arg1: i32, %arg2: memref<1x16x16x32xbf16, #tpu.memory_space<vmem>>, %arg3: memref<1x16x16x32xbf16, #tpu.memory_space<vmem>>, %arg4: memref<32x32xbf16, #tpu.memory_space<vmem>>, %arg5: memref<32x32xbf16, #tpu.memory_space<vmem>>, %arg6: memref<1x16x16x32xbf16, #tpu.memory_space<vmem>>, %arg7: memref<1x16x16x32xbf16, #tpu.memory_space<vmem>>, %arg8: memref<1x16x16x32xbf16, #tpu.memory_space<vmem>>, %arg9: memref<1x16x16x32xbf16, #tpu.memory_space<vmem>>) attributes {dimension_semantics = [#tpu.dimension_semantics<parallel>, #tpu.dimension_semantics<parallel>], iteration_bounds = array<i64: 2, 1>, scalar_prefetch = 0 : i64, scratch_operands = 0 : i64, tpu.core_type = #tpu.core_type<tc>, window_params = [{transform_indices = @transform_0, window_bounds = array<i64: 1, 16, 16, 32>}, {transform_indices = @transform_1, window_bounds = array<i64: 1, 16, 16, 32>}, {pipeline_mode = #tpu.pipeline_mode<synchronous>, transform_indices = @transform_2, window_bounds = array<i64: 32, 32>}, {pipeline_mode = #tpu.pipeline_mode<synchronous>, transform_indices = @transform_3, window_bounds = array<i64: 32, 32>}, {transform_indices = @transform_4, window_bounds = array<i64: 1, 16, 16, 32>}, {transform_indices = @transform_5, window_bounds = array<i64: 1, 16, 16, 32>}, {transform_indices = @transform_6, window_bounds = array<i64: 1, 16, 16, 32>}, {transform_indices = @transform_7, window_bounds = array<i64: 1, 16, 16, 32>}]} {
    %c0 = arith.constant 0 : index
    %c0_0 = arith.constant 0 : index
    %c0_1 = arith.constant 0 : index
    %c0_2 = arith.constant 0 : index
    %0 = vector.load %arg2[%c0, %c0_0, %c0_1, %c0_2] : memref<1x16x16x32xbf16, #tpu.memory_space<vmem>>, vector<1x16x16x32xbf16>
    %1 = vector.shape_cast %0 : vector<1x16x16x32xbf16> to vector<16x16x32xbf16>
    %2 = vector.shape_cast %1 : vector<16x16x32xbf16> to vector<256x32xbf16>
    %c0_3 = arith.constant 0 : index
    %c0_4 = arith.constant 0 : index
    %3 = vector.load %arg4[%c0_3, %c0_4] : memref<32x32xbf16, #tpu.memory_space<vmem>>, vector<32x32xbf16>
    %cst = arith.constant dense<0.000000e+00> : vector<256x32xf32>
    %4 = tpu.matmul %2, %3, %cst {dimension_numbers = #tpu.dot_dimension_numbers<[1], [0], [0], [1], [0, 0, 1, 1], [], []>} : vector<256x32xbf16>, vector<32x32xbf16>, vector<256x32xf32> -> vector<256x32xf32>
    %c0_5 = arith.constant 0 : index
    %c0_6 = arith.constant 0 : index
    %c0_7 = arith.constant 0 : index
    %c0_8 = arith.constant 0 : index
    %5 = vector.load %arg3[%c0_5, %c0_6, %c0_7, %c0_8] : memref<1x16x16x32xbf16, #tpu.memory_space<vmem>>, vector<1x16x16x32xbf16>
    %6 = vector.shape_cast %5 : vector<1x16x16x32xbf16> to vector<16x16x32xbf16>
    %7 = vector.shape_cast %6 : vector<16x16x32xbf16> to vector<256x32xbf16>
    %c0_9 = arith.constant 0 : index
    %c0_10 = arith.constant 0 : index
    %8 = vector.load %arg5[%c0_9, %c0_10] : memref<32x32xbf16, #tpu.memory_space<vmem>>, vector<32x32xbf16>
    %cst_11 = arith.constant dense<0.000000e+00> : vector<256x32xf32>
    %9 = tpu.matmul %7, %8, %cst_11 {dimension_numbers = #tpu.dot_dimension_numbers<[1], [0], [0], [1], [0, 0, 1, 1], [], []>} : vector<256x32xbf16>, vector<32x32xbf16>, vector<256x32xf32> -> vector<256x32xf32>
    %10 = vector.shape_cast %4 : vector<256x32xf32> to vector<16x16x32xf32>
    %11 = arith.truncf %10 : vector<16x16x32xf32> to vector<16x16x32xbf16>
    %12 = vector.shape_cast %9 : vector<256x32xf32> to vector<16x16x32xf32>
    %13 = arith.truncf %12 : vector<16x16x32xf32> to vector<16x16x32xbf16>
    %c0_12 = arith.constant 0 : index
    %c0_13 = arith.constant 0 : index
    %c0_14 = arith.constant 0 : index
    %c0_15 = arith.constant 0 : index
    %14 = vector.load %arg6[%c0_12, %c0_13, %c0_14, %c0_15] : memref<1x16x16x32xbf16, #tpu.memory_space<vmem>>, vector<1x16x16x32xbf16>
    %15 = vector.shape_cast %14 : vector<1x16x16x32xbf16> to vector<16x16x32xbf16>
    %16 = vector.shape_cast %11 : vector<16x16x32xbf16> to vector<1x16x16x32xbf16>
    tpu.vector_store %arg6[%c0_12, %c0_13, %c0_14, %c0_15], %16 {strides = array<i32>} : memref<1x16x16x32xbf16, #tpu.memory_space<vmem>>, vector<1x16x16x32xbf16>,
    %c0_16 = arith.constant 0 : index
    %c0_17 = arith.constant 0 : index
    %c0_18 = arith.constant 0 : index
    %c0_19 = arith.constant 0 : index
    %17 = vector.load %arg8[%c0_16, %c0_17, %c0_18, %c0_19] : memref<1x16x16x32xbf16, #tpu.memory_space<vmem>>, vector<1x16x16x32xbf16>
    %18 = vector.shape_cast %17 : vector<1x16x16x32xbf16> to vector<16x16x32xbf16>
    %19 = vector.shape_cast %13 : vector<16x16x32xbf16> to vector<1x16x16x32xbf16>
    tpu.vector_store %arg8[%c0_16, %c0_17, %c0_18, %c0_19], %19 {strides = array<i32>} : memref<1x16x16x32xbf16, #tpu.memory_space<vmem>>, vector<1x16x16x32xbf16>,
    %20 = tpu.transpose %11, [1, 0, 2] : vector<16x16x32xbf16> -> vector<16x16x32xbf16>
    %c0_20 = arith.constant 0 : index
    %c0_21 = arith.constant 0 : index
    %c0_22 = arith.constant 0 : index
    %c0_23 = arith.constant 0 : index
    %21 = vector.load %arg7[%c0_20, %c0_21, %c0_22, %c0_23] : memref<1x16x16x32xbf16, #tpu.memory_space<vmem>>, vector<1x16x16x32xbf16>
    %22 = vector.shape_cast %21 : vector<1x16x16x32xbf16> to vector<16x16x32xbf16>
    %23 = vector.shape_cast %20 : vector<16x16x32xbf16> to vector<1x16x16x32xbf16>
    tpu.vector_store %arg7[%c0_20, %c0_21, %c0_22, %c0_23], %23 {strides = array<i32>} : memref<1x16x16x32xbf16, #tpu.memory_space<vmem>>, vector<1x16x16x32xbf16>,
    %24 = tpu.transpose %13, [1, 0, 2] : vector<16x16x32xbf16> -> vector<16x16x32xbf16>
    %c0_24 = arith.constant 0 : index
    %c0_25 = arith.constant 0 : index
    %c0_26 = arith.constant 0 : index
    %c0_27 = arith.constant 0 : index
    %25 = vector.load %arg9[%c0_24, %c0_25, %c0_26, %c0_27] : memref<1x16x16x32xbf16, #tpu.memory_space<vmem>>, vector<1x16x16x32xbf16>
    %26 = vector.shape_cast %25 : vector<1x16x16x32xbf16> to vector<16x16x32xbf16>
    %27 = vector.shape_cast %24 : vector<16x16x32xbf16> to vector<1x16x16x32xbf16>
    tpu.vector_store %arg9[%c0_24, %c0_25, %c0_26, %c0_27], %27 {strides = array<i32>} : memref<1x16x16x32xbf16, #tpu.memory_space<vmem>>, vector<1x16x16x32xbf16>,
    return
  }
  func.func @transform_0(%arg0: i32, %arg1: i32) -> (i32, i32, i32, i32) {
    %c0_i32 = arith.constant 0 : i32
    %c0_i32_0 = arith.constant 0 : i32
    %c0_i32_1 = arith.constant 0 : i32
    return %arg0, %arg1, %c0_i32, %c0_i32_0 : i32, i32, i32, i32
  }
  func.func @transform_1(%arg0: i32, %arg1: i32) -> (i32, i32, i32, i32) {
    %c0_i32 = arith.constant 0 : i32
    %c0_i32_0 = arith.constant 0 : i32
    %c0_i32_1 = arith.constant 0 : i32
    return %arg0, %arg1, %c0_i32, %c0_i32_0 : i32, i32, i32, i32
  }
  func.func @transform_2(%arg0: i32, %arg1: i32) -> (i32, i32) {
    %c0_i32 = arith.constant 0 : i32
    %c0_i32_0 = arith.constant 0 : i32
    %c0_i32_1 = arith.constant 0 : i32
    return %c0_i32, %c0_i32_0 : i32, i32
  }
  func.func @transform_3(%arg0: i32, %arg1: i32) -> (i32, i32) {
    %c0_i32 = arith.constant 0 : i32
    %c0_i32_0 = arith.constant 0 : i32
    %c0_i32_1 = arith.constant 0 : i32
    return %c0_i32, %c0_i32_0 : i32, i32
  }
  func.func @transform_4(%arg0: i32, %arg1: i32) -> (i32, i32, i32, i32) {
    %c0_i32 = arith.constant 0 : i32
    %c0_i32_0 = arith.constant 0 : i32
    %c0_i32_1 = arith.constant 0 : i32
    return %arg0, %arg1, %c0_i32, %c0_i32_0 : i32, i32, i32, i32
  }
  func.func @transform_5(%arg0: i32, %arg1: i32) -> (i32, i32, i32, i32) {
    %c0_i32 = arith.constant 0 : i32
    %c0_i32_0 = arith.constant 0 : i32
    %c0_i32_1 = arith.constant 0 : i32
    return %arg0, %c0_i32, %arg1, %c0_i32_0 : i32, i32, i32, i32
  }
  func.func @transform_6(%arg0: i32, %arg1: i32) -> (i32, i32, i32, i32) {
    %c0_i32 = arith.constant 0 : i32
    %c0_i32_0 = arith.constant 0 : i32
    %c0_i32_1 = arith.constant 0 : i32
    return %arg0, %arg1, %c0_i32, %c0_i32_0 : i32, i32, i32, i32
  }
  func.func @transform_7(%arg0: i32, %arg1: i32) -> (i32, i32, i32, i32) {
    %c0_i32 = arith.constant 0 : i32
    %c0_i32_0 = arith.constant 0 : i32
    %c0_i32_1 = arith.constant 0 : i32
    return %arg0, %c0_i32, %arg1, %c0_i32_0 : i32, i32, i32, i32
  }
}

</mosaic_0001>

<bundles_post_ra>
// kernel: tpu_custom_call.1
= control target key start
LH: loop header
LB: loop body
LE: loop exit
PB: predicated region body
PF: predicated region fallthrough
CT: control target
= control target key end

     0   :  { %s4931_s0 = inlined_call_operand.hbm [shape: bf16[2,16,16,32], index: 0, kind: input, shape index: {}]   ;;  %s4932_s1 = inlined_call_operand.hbm [shape: bf16[2,16,16,32], index: 1, kind: input, shape index: {}]   ;;  %s4933_s2 = inlined_call_operand.hbm [shape: bf16[32,32], index: 2, kind: input, shape index: {}]   ;;  %s4934_s3 = inlined_call_operand.hbm [shape: bf16[32,32], index: 3, kind: input, shape index: {}]   ;;  %s4935_s4 = inlined_call_operand.hbm [shape: bf16[2,16,16,32], index: 4, kind: output, shape index: {0}]   ;;  %s4936_s5 = inlined_call_operand.hbm [shape: bf16[2,16,16,32], index: 5, kind: output, shape index: {1}]   ;;  %s4937_s6 = inlined_call_operand.hbm [shape: bf16[2,16,16,32], index: 6, kind: output, shape index: {2}]   ;;  %s4938_s7 = inlined_call_operand.hbm [shape: bf16[2,16,16,32], index: 7, kind: output, shape index: {3}]  }
   0x1   :  { %4951 = sst [smem:[#allocation28_spill]] %s4931_s0 }
   0x2   :  { %4952 = sst [smem:[#allocation29_spill]] %s4933_s2 }
   0x3   :  { %4953 = sst [smem:[#allocation30_spill]] %s4934_s3 }
   0x4   :  { %13 = vsyncpa [#allocation3], 0 }
   0x5   :  { %15 = vsyncpa [#allocation3 + $0x1], 0 }
   0x6   :  { %16 = vsyncpa [#allocation6], 0 }
   0x7   :  { %18 = vsyncpa [#allocation6 + $0x1], 0 }
   0x8   :  { %19 = vsyncpa [#allocation9], 0 }
   0x9   :  { %20 = vsyncpa [#allocation4], 0 }
   0xa   :  { %22 = vsyncpa [#allocation4 + $0x1], 0 }
   0xb   :  { %23 = vsyncpa [#allocation12], 0 }
   0xc   :  { %25 = vsyncpa [#allocation12 + $0x1], 0 }
   0xd   :  { %26 = vsyncpa [#allocation15], 0 }
   0xe   :  { %28 = vsyncpa [#allocation15 + $0x1], 0  ;;  %s3588_s24 = smov 0   ;;  %s3590_s25 = smov 0  }
   0xf   :  { %s3592_s26 = smov 0   ;;  %s3594_s27 = smov 0  }
  0x10   :  { %s3596_s28 = smov 0   ;;  %s3598_s29 = smov 0  }
  0x11 LB: > { %4954 = sst [smem:[#allocation23_spill]] %s3520_s26  ;;  %s3619_s30 = sadd.s32 4294967295, %s3532_s29   ;;  %s3532_s29 = sphi %s3598_s29, %s34_s29   ;;  %s3528_s28 = sphi %s3596_s28, %s4991_s28   ;;  %s3524_s27 = sphi %s3594_s27, %s4994_s27   ;;  %s3520_s26 = sphi %s3592_s26, %s4989_s26   ;;  %s3516_s25 = sphi %s3590_s25, %s4993_s25   ;;  %s3512_s24 = sphi %s3588_s24, %s4992_s24  }
  0x12   : > { %4955 = sst [smem:[#allocation24_spill]] %s3528_s28  ;;  %s4940_s8 = sadd.s32 4294967294, %s3532_s29  }
  0x13   : > { %p68_p0 = scmp.ne.s32.totalorder %s3516_s25, %s3512_s24  ;;  %p4939_p1 = scmp.eq.s32.totalorder %s3619_s30, 0 }
  0x14   : > { %p170_p3 = scmp.eq.s32.totalorder %s4940_s8, 1  ;;  %p2646_p5 = scmp.ge.s32.totalorder %s3532_s29, 1 }
  0x15   : > { %p3630_p4 = por %p4939_p1, %p68_p0  ;;  %p261_p7 = scmp.lt.s32.totalorder %s3532_s29, 3 }
  0x16   : > { %p3635_p6 = por %p170_p3, %p68_p0  ;;  %s3534_s12 = smov [#allocation7]  }
  0x17   : > { %s4956_s9 = scalar_select %p3630_p4, 1, 0 }
  0x18   : > { %s4957_s10 = scalar_select %p3635_p6, 1, 0 }
  0x19   : > { %p3640_p8 = pnand %p2646_p5, %p261_p7  ;;  %s273_s13 = sshll.u32 %s3534_s12, 4  ;;  %s3644_s13 = int_to_ptr.vmem [resolvable:$true] %s273_s13 }
  0x1a   : > { %4958 = sst [smem:[#allocation25_spill]] %s4957_s10  ;;  %s3535_s15 = smov [#allocation8]  }
  0x1b   : > { %p3105_p9 = pneg %p3640_p8  ;;  %s286_s16 = sshll.u32 %s3535_s15, 4  ;;  %s3655_s16 = int_to_ptr.vmem [resolvable:$true] %s286_s16 }
  0x1c   : > { %s4961_s2 = sld [smem:[#allocation29_spill]] }
  0x1d   : > { %p3651_p11 = pnand %p3105_p9, %p4939_p1 }
  0x1f   : > { %p3232_p13 = pneg %p3651_p11 }
  0x22   : > { %s3230_s19 = scalar_lea.hbm %s4961_s2, 256 }
  0x23   : > { %p3231_p12 = scmp.ne.s32.totalorder %s4961_s2, %s3230_s19  ;;  %p3237_p5 = scmp.lt.u32.totalorder %s3230_s19, %s4961_s2 }
  0x25   : > { %p3233_p0 = pnand %p3232_p13, %p3231_p12 }
  0x27   : > { %p3234_p3 = pneg %p3233_p0 }
  0x29   : > { %p3239_p7 = pnand %p3237_p5, %p3234_p3 }
  0x2b   : > { %3242 = shalt.err (!%p3239_p7)
}
  0x2c   : > { %s3243_s12 = scalar_lea.vmem %s3644_s13, 256  ;;  %p3251_p2 = scmp.lt.s32.totalorder %s3644_s13, %s3644_s13 }
  0x2d   : > { %p3244_p9 = scmp.ne.s32.totalorder %s3644_s13, %s3243_s12  ;;  %p3252_p12 = scmp.lt.s32.totalorder %s3243_s12, %s3243_s12 }
  0x2f   : > { %p3246_p10 = pnand %p3244_p9, %p3232_p13  ;;  %p3253_p0 = por %p3252_p12, %p3251_p2 }
  0x31   : > { %p3247_p1 = pneg %p3246_p10 }
  0x33   : > { %p3254_p6 = pnand %p3253_p0, %p3247_p1 }
  0x35   : > { %3257 = shalt.err (!%p3254_p6)
}
  0x36   : > { %s4942_s15 = smov 64   ;;  %s4944_s17 = smov 4  }
  0x37   : > { %3108 = dma.hbm_to_vmem [thread:$0]  (!%p3651_p11), %s4961_s2, 256, %s3644_s13, [#allocation6], %s4942_s15, %s4942_s15, %s4944_s17  }
  0x38   : > { %s4962_s3 = sld [smem:[#allocation30_spill]] }
  0x3e   : > { %s3258_s22 = scalar_lea.hbm %s4962_s3, 256 }
  0x3f   : > { %p3259_p1 = scmp.ne.s32.totalorder %s4962_s3, %s3258_s22  ;;  %p3265_p10 = scmp.lt.u32.totalorder %s3258_s22, %s4962_s3 }
  0x41   : > { %p3261_p2 = pnand %p3259_p1, %p3232_p13 }
  0x43   : > { %p3262_p6 = pneg %p3261_p2 }
  0x45   : > { %p3267_p3 = pnand %p3265_p10, %p3262_p6 }
  0x47   : > { %3270 = shalt.err (!%p3267_p3)
}
  0x48   : > { %s3271_s13 = scalar_lea.vmem %s3655_s16, 256  ;;  %p3279_p12 = scmp.lt.s32.totalorder %s3655_s16, %s3655_s16 }
  0x49   : > { %p3272_p5 = scmp.ne.s32.totalorder %s3655_s16, %s3271_s13  ;;  %p3280_p0 = scmp.lt.s32.totalorder %s3271_s13, %s3271_s13 }
  0x4b   : > { %p3274_p7 = pnand %p3272_p5, %p3232_p13  ;;  %p3281_p1 = por %p3280_p0, %p3279_p12 }
  0x4d   : > { %p3275_p9 = pneg %p3274_p7 }
  0x4f   : > { %p3282_p2 = pnand %p3281_p1, %p3275_p9 }
  0x51   : > { %3285 = shalt.err (!%p3282_p2)
}
  0x52   : > { %3111 = dma.hbm_to_vmem [thread:$0]  (!%p3651_p11), %s4962_s3, 256, %s3655_s16, [#allocation9], %s4942_s15, %s4942_s15, %s4944_s17  }
  0x53   : > { %s46_s14 = sadd.s32 1, %s3528_s28  ;;  %s55_s18 = sadd.s32 1, %s3520_s26 }
  0x54   : > { %p48_p13 = scmp.ge.s32.totalorder %s46_s14, 2  ;;  %p62_p6 = scmp.ne.s32.totalorder %s3520_s26, %s3516_s25 }
  0x55   : > { %p63_p10 = scmp.eq.s32.totalorder %s3532_s29, 0  ;;  %p3134_p3 = scmp.lt.s32.totalorder %s3532_s29, 2 }
  0x56   : > { %s4996_s14 = smov (%p48_p13, %s46_s14), 0  ;;  %p4964_p7 = scmp.eq.s32.totalorder %s3619_s30, 1 }
  0x57   : > { %4963 = sst [smem:[#allocation26_spill]] %s4996_s14  ;;  %p64_p5 = por %p63_p10, %p62_p6 }
  0x58   : > { %p3725_p9 = por %p4964_p7, %p62_p6  ;;  %s50_s20 = ssub.s32 %s3528_s28, %s4996_s14 }
  0x59   : > { %s300_s21 = sand.u32 1, %s3520_s26   ;;  %p53_p12 = scmp.eq.s32.totalorder %s50_s20, 0 }
  0x5a   : > { %s4965_s19 = scalar_select %p3725_p9, 1, 0 }
  0x5b   : > { %s3732_s16 = sshll.u32 %s300_s21, 7  ;;  %s2907_s22 = sshll.u32 %s3528_s28, 11 }
  0x5c   : > { %s3736_s23 = scalar_select %p53_p12, %s3520_s26, %s55_s18  }
  0x5d   : > { %s4967_s0 = sld [smem:[#allocation28_spill]]  ;;  %s304_s10 = scalar_lea.vmem [#allocation2], %s3732_s16 }
  0x5e   : > { %4966 = sst [smem:[#allocation27_spill]] %s3736_s23  ;;  %s314_s15 = sshll.u32 %s304_s10, 4  ;;  %s3750_s15 = int_to_ptr.vmem [resolvable:$true] %s314_s15 }
  0x5f   : > { %p3746_p11 = pnand %p3134_p3, %p64_p5  ;;  %s3755_s12 = scalar_lea.hbm %s4932_s1, %s2907_s22 }
  0x60   : > { %s3757_s13 = scalar_lea.sflag [#allocation3], %s300_s21 }
  0x61   : > { %p3288_p1 = pneg %p3746_p11 }
  0x63   : > { %s3741_s8 = scalar_lea.hbm %s4967_s0, %s2907_s22  ;;  %s3291_s14 = scalar_lea.hbm %s4967_s0, 4096 }
  0x64   : > { %s3286_s2 = scalar_lea.hbm %s3741_s8, 2048  ;;  %p3292_p6 = scmp.lt.u32.totalorder %s3741_s8, %s4967_s0 }
  0x65   : > { %p3287_p0 = scmp.ne.s32.totalorder %s3741_s8, %s3286_s2  ;;  %p3293_p10 = scmp.lt.u32.totalorder %s3291_s14, %s3286_s2 }
  0x66   : > { %p3295_p5 = scmp.lt.u32.totalorder %s3286_s2, %s3741_s8 }
  0x67   : > { %p3289_p2 = pnand %p3288_p1, %p3287_p0  ;;  %p3294_p3 = por %p3293_p10, %p3292_p6 }
  0x69   : > { %p3290_p13 = pneg %p3289_p2  ;;  %p3296_p7 = por %p3295_p5, %p3294_p3 }
  0x6b   : > { %p3297_p12 = pnand %p3296_p7, %p3290_p13 }
  0x6d   : > { %3300 = shalt.err (!%p3297_p12)
}
  0x6e   : > { %s3301_s17 = scalar_lea.vmem %s3750_s15, 2048  ;;  %s3538_s3 = smov [#allocation2]  }
  0x6f   : > { %p3302_p0 = scmp.ne.s32.totalorder %s3750_s15, %s3301_s17  ;;  %s3306_s21 = sshll.u32 %s3538_s3, 4  ;;  %s3307_s21 = int_to_ptr.vmem [resolvable:$false] %s3306_s21 }
  0x70   : > { %s3308_s28 = scalar_lea.vmem %s3307_s21, 4096  ;;  %p3309_p4 = scmp.lt.s32.totalorder %s3750_s15, %s3307_s21 }
  0x71   : > { %p3304_p2 = pnand %p3302_p0, %p3288_p1  ;;  %p3310_p6 = scmp.lt.s32.totalorder %s3308_s28, %s3301_s17 }
  0x73   : > { %p3305_p9 = pneg %p3304_p2  ;;  %p3311_p10 = por %p3310_p6, %p3309_p4 }
  0x75   : > { %p3312_p3 = pnand %p3311_p10, %p3305_p9 }
  0x77   : > { %3315 = shalt.err (!%p3312_p3)
}
  0x78   : > { %s4969_s2 = smov 4   ;;  %s4970_s14 = smov 64  }
  0x79   : > { %3115 = dma.hbm_to_vmem [thread:$0]  (!%p3746_p11), %s3741_s8, 2048, %s3750_s15, %s3757_s13, %s4970_s14, %s4970_s14, %s4969_s2  }
  0x7a   : > { %s328_s22 = scalar_lea.vmem [#allocation5], %s3732_s16  ;;  %s324_s18 = sand.u32 1, %s3532_s29  }
  0x7b   : > { %s338_s23 = sshll.u32 %s328_s22, 4  ;;  %s3792_s10 = scalar_lea.sflag [#allocation6], %s324_s18  ;;  %s3790_s23 = int_to_ptr.vmem [resolvable:$true] %s338_s23 }
  0x7c   : > { %s3316_s17 = scalar_lea.hbm %s3755_s12, 2048  ;;  %s3321_s28 = scalar_lea.hbm %s4932_s1, 4096 }
  0x7d   : > { %p3317_p4 = scmp.ne.s32.totalorder %s3755_s12, %s3316_s17  ;;  %p3322_p5 = scmp.lt.u32.totalorder %s3755_s12, %s4932_s1 }
  0x7e   : > { %p3323_p7 = scmp.lt.u32.totalorder %s3321_s28, %s3316_s17  ;;  %p3325_p0 = scmp.lt.u32.totalorder %s3316_s17, %s3755_s12 }
  0x7f   : > { %p3319_p9 = pnand %p3317_p4, %p3288_p1 }
  0x80   : > { %p3324_p12 = por %p3323_p7, %p3322_p5 }
  0x81   : > { %p3320_p13 = pneg %p3319_p9 }
  0x82   : > { %p3326_p2 = por %p3325_p0, %p3324_p12 }
  0x84   : > { %p3327_p6 = pnand %p3326_p2, %p3320_p13 }
  0x86   : > { %3330 = shalt.err (!%p3327_p6)
}
  0x87   : > { %s3331_s15 = scalar_lea.vmem %s3790_s23, 2048  ;;  %s3539_s16 = smov [#allocation5]  }
  0x88   : > { %p3332_p10 = scmp.ne.s32.totalorder %s3790_s23, %s3331_s15  ;;  %s3336_s8 = sshll.u32 %s3539_s16, 4  ;;  %s3337_s8 = int_to_ptr.vmem [resolvable:$false] %s3336_s8 }
  0x89   : > { %s3338_s0 = scalar_lea.vmem %s3337_s8, 4096  ;;  %p3339_p9 = scmp.lt.s32.totalorder %s3790_s23, %s3337_s8 }
  0x8a   : > { %p3334_p3 = pnand %p3332_p10, %p3288_p1  ;;  %p3340_p5 = scmp.lt.s32.totalorder %s3338_s0, %s3331_s15 }
  0x8c   : > { %p3335_p4 = pneg %p3334_p3  ;;  %p3341_p7 = por %p3340_p5, %p3339_p9 }
  0x8e   : > { %p3342_p12 = pnand %p3341_p7, %p3335_p4 }
  0x90   : > { %3345 = shalt.err (!%p3342_p12)
}
  0x91   : > { %3118 = dma.hbm_to_vmem [thread:$0]  (!%p3746_p11), %s3755_s12, 2048, %s3790_s23, %s3792_s10, %s4970_s14, %s4970_s14, %s4969_s2  }
  0x92   : > { %350 = sbr.rel (%p3640_p8) target bundleno = 570 (0x23a), region = 36  ;;  %s3824_s26 = sand.u32 (!%p3640_p8), 1, %s3516_s25  }
  0x93   : > { %s3827_s13 = sshll.u32 (!%p3640_p8), %s3824_s26, 7  ;;  %s353_s20 = scalar_lea.sflag (!%p3640_p8), [#allocation3], %s3824_s26 }
  0x94   : > { %s3831_s22 = scalar_lea.vmem (!%p3640_p8), [#allocation2], %s3827_s13  ;;  %p4971_p1 = scmp.ne.s32.totalorder (!%p3640_p8), %s4956_s9, 0 }
  0x99   : > { %3483 = dma.done.wait (%p4971_p1), %s353_s20, 2048  }
  0x9a   : > { %3485 = vsyncadd (%p4971_p1), %s353_s20, 4294965248  ;;  %s361_s11 = sand.u32 1, %s3619_s30   ;;  %s3841_s2 = scalar_lea.vmem [#allocation5], %s3827_s13 }
  0x9b   : > { %s362_s12 = scalar_lea.sflag [#allocation6], %s361_s11 }
  0x9c   : > { %3487 = dma.done.wait (%p4971_p1), %s362_s12, 2048  }
  0x9d   : > { %3489 = vsyncadd (%p4971_p1), %s362_s12, 4294965248  ;;  %p4972_p8 = scmp.eq.s32.totalorder %s3619_s30, 0 }
  0x9f   : > { %3491 = dma.done.wait (%p4972_p8), [#allocation6], 256   ;;  %p4973_p11 = pmov %p4972_p8 }
  0xa0   : > { %p4974_p13 = pmov %p4972_p8 }
  0xa1   : > { %3493 = vsyncadd (%p4973_p11), [#allocation6], 4294967040 }
  0xa2   : > { %3495 = dma.done.wait (%p4974_p13), [#allocation9], 256   ;;  %p4975_p0 = pmov %p4972_p8 }
  0xa3   : > { %v3194_v0 = vld [vmem:[#allocation7] sm:$0xff]   ;;  %v3195_v1 = vld [vmem:[#allocation8] sm:$0xff]   ;;  %v3196_v2 = vld [vmem:[#allocation7 + $0x8] sm:$0xff]   ;;  %vm559_vm0 = vcmask 261120   ;;  %vm1250_vm1 = vcmask 257024   ;;  %s3936_s9 = scalar_lea.vmem [#allocation10], %s3827_s13 }
  0xa4   : > { %3497 = vsyncadd (%p4975_p0), [#allocation9], 4294967040  ;;  %3013 = vmatprep.subr.bf16.mxu0 %v3194_v0  ;;  %3049 = vmatprep.subr.bf16.mxu1 %v3195_v1  ;;  %v3197_v3 = vld [vmem:[#allocation8 + $0x8] sm:$0xff]   ;;  %v3198_v4 = vld [vmem:[%s3831_s22] sm:$0xff]   ;;  %s3949_s14 = scalar_lea.vmem [#allocation13], %s3827_s13  ;;  %s4448_s23 = scalar_lea.vmem [#allocation11], %s3827_s13 }
  0xa5   : > { %3014 = vmatpush3.bf16.msra.mxu0 %v3194_v0  ;;  %3050 = vmatpush3.bf16.msra.mxu1 %v3195_v1  ;;  %v3199_v5 = vld [vmem:[%s3841_s2] sm:$0xff]   ;;  %v3200_v6 = vld [vmem:[%s3831_s22 + $0x8] sm:$0xff]   ;;  %v3202_v8 = vld [vmem:[%s3831_s22 + $0x10] sm:$0xff]   ;;  %s4507_s18 = scalar_lea.vmem [#allocation14], %s3827_s13  ;;  %s4518_s10 = sshll.u32 %s3524_s27, 11 }
  0xa6   : > { %3015 = vmatprep.subr.bf16.mxu0 %v3196_v2  ;;  %3051 = vmatprep.subr.bf16.mxu1 %v3197_v3  ;;  %v3201_v7 = vld [vmem:[%s3841_s2 + $0x8] sm:$0xff]   ;;  %v3203_v9 = vld [vmem:[%s3841_s2 + $0x10] sm:$0xff]   ;;  %v3204_v10 = vld [vmem:[%s3831_s22 + $0x18] sm:$0xff]   ;;  %s2355_s17 = sshll.u32 %s3936_s9, 4  ;;  %s4561_s21 = scalar_lea.hbm %s4935_s4, %s4518_s10  ;;  %s4563_s17 = int_to_ptr.vmem [resolvable:$true] %s2355_s17 }
  0xa7   : > { %3017 = vmatprep.mubr.msk.bf16.mxu0 %vm559_vm0, %v3198_v4  ;;  %3053 = vmatprep.mubr.msk.bf16.mxu1 %vm559_vm0, %v3199_v5  ;;  %v3205_v11 = vld [vmem:[%s3841_s2 + $0x18] sm:$0xff]   ;;  %v3206_v12 = vld [vmem:[%s3831_s22 + $0x20] sm:$0xff]   ;;  %v3208_v14 = vld [vmem:[%s3831_s22 + $0x28] sm:$0xff]   ;;  %v1432_v5 = vlaneseq  ;;  %s2324_s28 = scalar_lea.sflag [#allocation4], %s3824_s26  ;;  %s3346_s15 = scalar_lea.vmem %s4563_s17, 2048 }
  0xa8   : > { %v3207_v13 = vld [vmem:[%s3841_s2 + $0x20] sm:$0xff]   ;;  %v3209_v15 = vld [vmem:[%s3841_s2 + $0x28] sm:$0xff]   ;;  %v3210_v16 = vld [vmem:[%s3831_s22 + $0x30] sm:$0xff]   ;;  %p3347_p2 = scmp.ne.s32.totalorder %s4563_s17, %s3346_s15  ;;  %p4977_p6 = scmp.ne.s32.totalorder %s4965_s19, 0 }
  0xa9   : > { %3016 = vmatpush3.bf16.msra.mxu0 %v3196_v2  ;;  %3052 = vmatpush3.bf16.msra.mxu1 %v3197_v3  ;;  %v3211_v17 = vld [vmem:[%s3841_s2 + $0x30] sm:$0xff]   ;;  %v3212_v18 = vld [vmem:[%s3831_s22 + $0x38] sm:$0xff]   ;;  %v3214_v20 = vld [vmem:[%s3831_s22 + $0x40] sm:$0xff]   ;;  %v3540_v3 = vmov 1983009808   ;;  %s3542_s16 = smov [#allocation10]  }
  0xaa   : > { %v3213_v19 = vld [vmem:[%s3841_s2 + $0x38] sm:$0xff]   ;;  %v3215_v21 = vld [vmem:[%s3841_s2 + $0x40] sm:$0xff]   ;;  %v3216_v22 = vld [vmem:[%s3831_s22 + $0x48] sm:$0xff]   ;;  %v1430_v4 = vunpack.c.l.s4 %v3540_v3  ;;  %p3348_p10 = pnand %p3347_p2, %p4977_p6  ;;  %s3350_s8 = sshll.u32 %s3542_s16, 4  ;;  %s3351_s8 = int_to_ptr.vmem [resolvable:$false] %s3350_s8 }
  0xab   : > { %v3217_v23 = vld [vmem:[%s3841_s2 + $0x48] sm:$0xff]   ;;  %v3218_v24 = vld [vmem:[%s3831_s22 + $0x50] sm:$0xff]   ;;  %v3220_v26 = vld [vmem:[%s3831_s22 + $0x58] sm:$0xff]   ;;  %s3352_s0 = scalar_lea.vmem %s3351_s8, 4096  ;;  %p3353_p4 = scmp.lt.s32.totalorder %s4563_s17, %s3351_s8 }
  0xac   : > { %3018 = vmatmul.mubr.msk.bf16.vlgmr.msra.gmra.mrb[0].mxu0 %vm559_vm0, %v3200_v6  ;;  %3054 = vmatmul.mubr.msk.bf16.vlgmr.msra.gmra.mrb[0].mxu1 %vm559_vm0, %v3201_v7  ;;  %v3219_v25 = vld [vmem:[%s3841_s2 + $0x50] sm:$0xff]   ;;  %v3221_v27 = vld [vmem:[%s3841_s2 + $0x58] sm:$0xff]   ;;  %v3222_v28 = vld [vmem:[%s3831_s22 + $0x60] sm:$0xff]   ;;  %p3349_p3 = pneg %p3348_p10  ;;  %p3354_p9 = scmp.lt.s32.totalorder %s3352_s0, %s3346_s15 }
  0xad   : > { %3021 = vmatprep.mubr.msk.bf16.mxu0 %vm559_vm0, %v3202_v8  ;;  %3057 = vmatprep.mubr.msk.bf16.mxu1 %vm559_vm0, %v3203_v9  ;;  %v3223_v29 = vld [vmem:[%s3841_s2 + $0x60] sm:$0xff]   ;;  %v3224_v30 = vld [vmem:[%s3831_s22 + $0x68] sm:$0xff]   ;;  %v3226_v32 = vld [vmem:[%s3831_s22 + $0x70] sm:$0xff]   ;;  %v1431_v8 = vunpack.c.0.s8 %v1430_v4  ;;  %v4021_v9 = vshrl.u32 %v1432_v5, 7 }
  0xae   : > { %v3225_v31 = vld [vmem:[%s3841_s2 + $0x68] sm:$0xff]   ;;  %v3227_v33 = vld [vmem:[%s3841_s2 + $0x70] sm:$0xff]   ;;  %v3228_v34 = vld [vmem:[%s3831_s22 + $0x78] sm:$0xff]   ;;  %p3355_p5 = por %p3354_p9, %p3353_p4 }
  0xaf   : > { %v3229_v35 = vld [vmem:[%s3841_s2 + $0x78] sm:$0xff]  }
  0xb0   : > { %p3356_p7 = pnand %p3355_p5, %p3349_p3 }
  0xb4   : > { %3022 = vmatmul.mubr.msk.bf16.gmra.mrb[4].mxu0 %vm559_vm0, %v3204_v10  ;;  %3058 = vmatmul.mubr.msk.bf16.gmra.mrb[4].mxu1 %vm559_vm0, %v3205_v11 }
  0xb5   : > { %3025 = vmatprep.mubr.msk.bf16.mxu0 %vm559_vm0, %v3206_v12  ;;  %3061 = vmatprep.mubr.msk.bf16.mxu1 %vm559_vm0, %v3207_v13 }
  0xbc   : > { %3026 = vmatmul.mubr.msk.bf16.gmra.mrb[8].mxu0 %vm559_vm0, %v3208_v14  ;;  %3062 = vmatmul.mubr.msk.bf16.gmra.mrb[8].mxu1 %vm559_vm0, %v3209_v15 }
  0xbd   : > { %3029 = vmatprep.mubr.msk.bf16.mxu0 %vm559_vm0, %v3210_v16  ;;  %3065 = vmatprep.mubr.msk.bf16.mxu1 %vm559_vm0, %v3211_v17 }
  0xc4   : > { %3030 = vmatmul.mubr.msk.bf16.gmra.mrb[12].mxu0 %vm559_vm0, %v3212_v18  ;;  %3066 = vmatmul.mubr.msk.bf16.gmra.mrb[12].mxu1 %vm559_vm0, %v3213_v19 }
  0xc5   : > { %3033 = vmatprep.mubr.msk.bf16.mxu0 %vm559_vm0, %v3214_v20  ;;  %3069 = vmatprep.mubr.msk.bf16.mxu1 %vm559_vm0, %v3215_v21 }
  0xcc   : > { %3034 = vmatmul.mubr.msk.bf16.gmra.mrb[16].mxu0 %vm559_vm0, %v3216_v22  ;;  %3070 = vmatmul.mubr.msk.bf16.gmra.mrb[16].mxu1 %vm559_vm0, %v3217_v23 }
  0xcd   : > { %3037 = vmatprep.mubr.msk.bf16.mxu0 %vm559_vm0, %v3218_v24  ;;  %3073 = vmatprep.mubr.msk.bf16.mxu1 %vm559_vm0, %v3219_v25  ;;  %v4036_v25 = vsub.s32 %v1431_v8, %v4021_v9 }
  0xd4   : > { %3038 = vmatmul.mubr.msk.bf16.gmra.mrb[20].mxu0 %vm559_vm0, %v3220_v26  ;;  %3074 = vmatmul.mubr.msk.bf16.gmra.mrb[20].mxu1 %vm559_vm0, %v3221_v27 }
  0xd5   : > { %3041 = vmatprep.mubr.msk.bf16.mxu0 %vm559_vm0, %v3222_v28  ;;  %3077 = vmatprep.mubr.msk.bf16.mxu1 %vm559_vm0, %v3223_v29 }
  0xdc   : > { %3042 = vmatmul.mubr.msk.bf16.gmra.mrb[24].mxu0 %vm559_vm0, %v3224_v30  ;;  %3078 = vmatmul.mubr.msk.bf16.gmra.mrb[24].mxu1 %vm559_vm0, %v3225_v31 }
  0xdd   : > { %3045 = vmatprep.mubr.msk.bf16.mxu0 %vm559_vm0, %v3226_v32  ;;  %3081 = vmatprep.mubr.msk.bf16.mxu1 %vm559_vm0, %v3227_v33 }
  0xe4   : > { %3046 = vmatmul.mubr.msk.bf16.gmra.mrb[28].mxu0 %vm559_vm0, %v3228_v34  ;;  %3082 = vmatmul.mubr.msk.bf16.gmra.mrb[28].mxu1 %vm559_vm0, %v3229_v35 }
 0x17f   : > { %v3919_v36 = vpop.f32.mrb[0].mxu0  ;;  %v3923_v38 = vpop.f32.mrb[0].mxu1 }
 0x180   : > { %v2911_v37 = vpack.c.bf16 %v3919_v36, %v3919_v36  ;;  %v3925_v39 = vpop.f32.mrb[1].mxu0  ;;  %v2943_v40 = vpack.c.bf16 %v3923_v38, %v3923_v38  ;;  %v3931_v42 = vpop.f32.mrb[1].mxu1 }
 0x181   : > { %v2909_v41 = vpack.c.bf16 %v3925_v39, %v3925_v39  ;;  %v3933_v43 = vpop.f32.mrb[2].mxu0  ;;  %v2941_v44 = vpack.c.bf16 %v3931_v42, %v3931_v42  ;;  %v3944_v46 = vpop.f32.mrb[2].mxu1 }
 0x182   : > { %1253 = vst.msk [vmem:[%s3936_s9 + $0x8] sm:$0xf] %vm1250_vm1, %v2911_v37  ;;  %v2912_v45 = vpack.c.bf16 %v3933_v43, %v3933_v43  ;;  %v3946_v47 = vpop.f32.mrb[3].mxu0  ;;  %1397 = vst.msk [vmem:[%s3949_s14 + $0x8] sm:$0xf] %vm1250_vm1, %v2943_v40  ;;  %v2944_v48 = vpack.c.bf16 %v3944_v46, %v3944_v46  ;;  %v3959_v50 = vpop.f32.mrb[3].mxu1 }
 0x183   : > { %1251 = vst.msk [vmem:[%s3936_s9] sm:$0xf] %vm1250_vm1, %v2909_v41  ;;  %v2910_v49 = vpack.c.bf16 %v3946_v47, %v3946_v47  ;;  %1395 = vst.msk [vmem:[%s3949_s14] sm:$0xf] %vm1250_vm1, %v2941_v44  ;;  %v2942_v51 = vpack.c.bf16 %v3959_v50, %v3959_v50 }
 0x184   : > { %1254 = vst.msk [vmem:[%s3936_s9 + $0xc] sm:$0xf] %vm1250_vm1, %v2912_v45  ;;  %1398 = vst.msk [vmem:[%s3949_s14 + $0xc] sm:$0xf] %vm1250_vm1, %v2944_v48 }
 0x185   : > { %1252 = vst.msk [vmem:[%s3936_s9 + $0x4] sm:$0xf] %vm1250_vm1, %v2910_v49  ;;  %1396 = vst.msk [vmem:[%s3949_s14 + $0x4] sm:$0xf] %vm1250_vm1, %v2942_v51 }
 0x187   : > { %v3973_v52 = vpop.f32.mrb[4].mxu0  ;;  %v3977_v54 = vpop.f32.mrb[4].mxu1 }
 0x188   : > { %v2915_v53 = vpack.c.bf16 %v3973_v52, %v3973_v52  ;;  %v3979_v55 = vpop.f32.mrb[5].mxu0  ;;  %v2947_v56 = vpack.c.bf16 %v3977_v54, %v3977_v54  ;;  %v3985_v58 = vpop.f32.mrb[5].mxu1 }
 0x189   : > { %v2913_v57 = vpack.c.bf16 %v3979_v55, %v3979_v55  ;;  %v3987_v59 = vpop.f32.mrb[6].mxu0  ;;  %v2945_v60 = vpack.c.bf16 %v3985_v58, %v3985_v58  ;;  %v3995_v62 = vpop.f32.mrb[6].mxu1 }
 0x18a   : > { %1257 = vst.msk [vmem:[%s3936_s9 + $0x18] sm:$0xf] %vm1250_vm1, %v2915_v53  ;;  %v2916_v61 = vpack.c.bf16 %v3987_v59, %v3987_v59  ;;  %v3997_v63 = vpop.f32.mrb[7].mxu0  ;;  %1401 = vst.msk [vmem:[%s3949_s14 + $0x18] sm:$0xf] %vm1250_vm1, %v2947_v56  ;;  %v2948_v0 = vpack.c.bf16 %v3995_v62, %v3995_v62  ;;  %v4007_v2 = vpop.f32.mrb[7].mxu1 }
 0x18b   : > { %1255 = vst.msk [vmem:[%s3936_s9 + $0x10] sm:$0xf] %vm1250_vm1, %v2913_v57  ;;  %v2914_v1 = vpack.c.bf16 %v3997_v63, %v3997_v63  ;;  %1399 = vst.msk [vmem:[%s3949_s14 + $0x10] sm:$0xf] %vm1250_vm1, %v2945_v60  ;;  %v2946_v6 = vpack.c.bf16 %v4007_v2, %v4007_v2 }
 0x18c   : > { %1258 = vst.msk [vmem:[%s3936_s9 + $0x1c] sm:$0xf] %vm1250_vm1, %v2916_v61  ;;  %1402 = vst.msk [vmem:[%s3949_s14 + $0x1c] sm:$0xf] %vm1250_vm1, %v2948_v0 }
 0x18d   : > { %1256 = vst.msk [vmem:[%s3936_s9 + $0x14] sm:$0xf] %vm1250_vm1, %v2914_v1  ;;  %1400 = vst.msk [vmem:[%s3949_s14 + $0x14] sm:$0xf] %vm1250_vm1, %v2946_v6 }
 0x18f   : > { %v3027_v7 = vpop.f32.mrb[8].mxu0  ;;  %v3063_v12 = vpop.f32.mrb[8].mxu1 }
 0x190   : > { %v2919_v10 = vpack.c.bf16 %v3027_v7, %v3027_v7  ;;  %v2805_v11 = vpack.c.bf16 %v3027_v7, %v3919_v36  ;;  %v674_v13 = vpop.f32.mrb[9].mxu0  ;;  %v2951_v14 = vpack.c.bf16 %v3063_v12, %v3063_v12  ;;  %v2853_v15 = vpack.c.bf16 %v3063_v12, %v3923_v38  ;;  %v1011_v18 = vpop.f32.mrb[9].mxu1 }
 0x191   : > { %v2917_v16 = vpack.c.bf16 %v674_v13, %v674_v13  ;;  %v2797_v17 = vpack.c.bf16 %v674_v13, %v3925_v39  ;;  %v4026_v19 = vpop.f32.mrb[10].mxu0  ;;  %v2949_v20 = vpack.c.bf16 %v1011_v18, %v1011_v18  ;;  %v2845_v21 = vpack.c.bf16 %v1011_v18, %v3931_v42  ;;  %v3064_v23 = vpop.f32.mrb[10].mxu1 }
 0x192   : > { %1261 = vst.msk [vmem:[%s3936_s9 + $0x28] sm:$0xf] %vm1250_vm1, %v2919_v10  ;;  %v2920_v22 = vpack.c.bf16 %v4026_v19, %v4026_v19  ;;  %v4033_v24 = vpop.f32.mrb[11].mxu0  ;;  %1405 = vst.msk [vmem:[%s3949_s14 + $0x28] sm:$0xf] %vm1250_vm1, %v2951_v14  ;;  %v2806_v26 = vpack.c.bf16 %v4026_v19, %v3933_v43  ;;  %v2952_v27 = vpack.c.bf16 %v3064_v23, %v3064_v23  ;;  %v1014_v28 = vpop.f32.mrb[11].mxu1 }
 0x193   : > { %1259 = vst.msk [vmem:[%s3936_s9 + $0x20] sm:$0xf] %vm1250_vm1, %v2917_v16  ;;  %1403 = vst.msk [vmem:[%s3949_s14 + $0x20] sm:$0xf] %vm1250_vm1, %v2949_v20  ;;  %v2854_v29 = vpack.c.bf16 %v3064_v23, %v3944_v46  ;;  %v2918_v30 = vpack.c.bf16 %v4033_v24, %v4033_v24  ;;  %v2798_v31 = vpack.c.bf16 %v4033_v24, %v3946_v47 }
 0x194   : > { %1262 = vst.msk [vmem:[%s3936_s9 + $0x2c] sm:$0xf] %vm1250_vm1, %v2920_v22  ;;  %1406 = vst.msk [vmem:[%s3949_s14 + $0x2c] sm:$0xf] %vm1250_vm1, %v2952_v27  ;;  %v2950_v32 = vpack.c.bf16 %v1014_v28, %v1014_v28  ;;  %v2846_v33 = vpack.c.bf16 %v1014_v28, %v3959_v50  ;;  %v4059_v34 = vrot.slane %v2805_v11, %v4036_v25 }
 0x195   : > { %1260 = vst.msk [vmem:[%s3936_s9 + $0x24] sm:$0xf] %vm1250_vm1, %v2918_v30  ;;  %v4062_v35 = vrot.slane %v2853_v15, %v4036_v25  ;;  %v4067_v37 = vrot.slane %v2797_v17, %v4036_v25  ;;  %v4070_v38 = vrot.slane %v2845_v21, %v4036_v25  ;;  %v4119_v8 = vrot.slane %v2806_v26, %v4036_v25 }
 0x196   : > { %1404 = vst.msk [vmem:[%s3949_s14 + $0x24] sm:$0xf] %vm1250_vm1, %v2950_v32  ;;  %v4122_v10 = vrot.slane %v2854_v29, %v4036_v25  ;;  %v4127_v12 = vrot.slane %v2798_v31, %v4036_v25  ;;  %v4130_v13 = vrot.slane %v2846_v33, %v4036_v25 }
 0x197   : > { %v3031_v36 = vpop.f32.mrb[12].mxu0  ;;  %v3067_v41 = vpop.f32.mrb[12].mxu1 }
 0x198   : > { %v2923_v39 = vpack.c.bf16 %v3031_v36, %v3031_v36  ;;  %v2807_v40 = vpack.c.bf16 %v3031_v36, %v3973_v52  ;;  %v690_v42 = vpop.f32.mrb[13].mxu0  ;;  %v2955_v43 = vpack.c.bf16 %v3067_v41, %v3067_v41  ;;  %v2855_v44 = vpack.c.bf16 %v3067_v41, %v3977_v54  ;;  %v1027_v47 = vpop.f32.mrb[13].mxu1 }
 0x199   : > { %v2921_v45 = vpack.c.bf16 %v690_v42, %v690_v42  ;;  %v2799_v46 = vpack.c.bf16 %v690_v42, %v3979_v55  ;;  %v3032_v48 = vpop.f32.mrb[14].mxu0  ;;  %v2953_v50 = vpack.c.bf16 %v1027_v47, %v1027_v47  ;;  %v2847_v51 = vpack.c.bf16 %v1027_v47, %v3985_v58  ;;  %v3068_v53 = vpop.f32.mrb[14].mxu1 }
 0x19a   : > { %1265 = vst.msk [vmem:[%s3936_s9 + $0x38] sm:$0xf] %vm1250_vm1, %v2923_v39  ;;  %v4078_v49 = vrot.slane %v2807_v40, %v4036_v25  ;;  %v2924_v52 = vpack.c.bf16 %v3032_v48, %v3032_v48  ;;  %v693_v56 = vpop.f32.mrb[15].mxu0  ;;  %1409 = vst.msk [vmem:[%s3949_s14 + $0x38] sm:$0xf] %vm1250_vm1, %v2955_v43  ;;  %v4084_v54 = vrot.slane %v2855_v44, %v4036_v25  ;;  %v1030_v61 = vpop.f32.mrb[15].mxu1 }
 0x19b   : > { %1263 = vst.msk [vmem:[%s3936_s9 + $0x30] sm:$0xf] %vm1250_vm1, %v2921_v45  ;;  %v4089_v55 = vrot.slane %v2799_v46, %v4036_v25  ;;  %v2808_v57 = vpack.c.bf16 %v3032_v48, %v3987_v59  ;;  %v2956_v60 = vpack.c.bf16 %v3068_v53, %v3068_v53  ;;  %1407 = vst.msk [vmem:[%s3949_s14 + $0x30] sm:$0xf] %vm1250_vm1, %v2953_v50  ;;  %v3541_v36 = vmov 1934713408  }
 0x19c   : > { %v1627_v58 = vcombine.low %v4059_v34, %v4078_v49  ;;  %v1628_v0 = vcombine.high %v4059_v34, %v4078_v49  ;;  %v4099_v1 = vrot.slane %v2847_v51, %v4036_v25  ;;  %1266 = vst.msk [vmem:[%s3936_s9 + $0x3c] sm:$0xf] %vm1250_vm1, %v2924_v52  ;;  %v2856_v3 = vpack.c.bf16 %v3068_v53, %v3995_v62 }
 0x19d   : > { %v2075_v59 = vcombine.low %v4062_v35, %v4084_v54  ;;  %v2076_v4 = vcombine.high %v4062_v35, %v4084_v54  ;;  %v1491_v5 = vcombine.low %v4067_v37, %v4089_v55  ;;  %v1492_v6 = vcombine.high %v4067_v37, %v4089_v55  ;;  %1410 = vst.msk [vmem:[%s3949_s14 + $0x3c] sm:$0xf] %vm1250_vm1, %v2956_v60 }
 0x19e   : > { %v1939_v7 = vcombine.low %v4070_v38, %v4099_v1  ;;  %v1940_v62 = vcombine.high %v4070_v38, %v4099_v1  ;;  %v4133_v14 = vrot.slane %v2808_v57, %v4036_v25  ;;  %v4136_v15 = vrot.slane %v2856_v3, %v4036_v25 }
 0x19f   : > { %v4124_v11 = vpop.f32.mrb[16].mxu0  ;;  %v4138_v16 = vpop.f32.mrb[16].mxu1  ;;  %v2922_v18 = vpack.c.bf16 %v693_v56, %v693_v56  ;;  %v2800_v19 = vpack.c.bf16 %v693_v56, %v3997_v63  ;;  %v2954_v20 = vpack.c.bf16 %v1030_v61, %v1030_v61  ;;  %v2848_v21 = vpack.c.bf16 %v1030_v61, %v4007_v2 }
 0x1a0   : > { %v4140_v17 = vpop.f32.mrb[17].mxu0  ;;  %v4144_v22 = vpop.f32.mrb[17].mxu1  ;;  %v1643_v24 = vcombine.low %v4119_v8, %v4133_v14  ;;  %v1644_v26 = vcombine.high %v4119_v8, %v4133_v14  ;;  %v2091_v27 = vcombine.low %v4122_v10, %v4136_v15  ;;  %v2092_v28 = vcombine.high %v4122_v10, %v4136_v15 }
 0x1a1   : > { %v4146_v23 = vpop.f32.mrb[18].mxu0  ;;  %v4156_v63 = vpop.f32.mrb[18].mxu1  ;;  %1264 = vst.msk [vmem:[%s3936_s9 + $0x34] sm:$0xf] %vm1250_vm1, %v2922_v18  ;;  %v4163_v29 = vrot.slane %v2800_v19, %v4036_v25  ;;  %1408 = vst.msk [vmem:[%s3949_s14 + $0x34] sm:$0xf] %vm1250_vm1, %v2954_v20  ;;  %v4168_v30 = vrot.slane %v2848_v21, %v4036_v25  ;;  %v2927_v31 = vpack.c.bf16 %v4124_v11, %v4124_v11  ;;  %v1494_v39 = vunpack.c.l.s4 %v3541_v36 }
 0x1a2   : > { %v4158_v2 = vpop.f32.mrb[19].mxu0  ;;  %v2959_v32 = vpack.c.bf16 %v4138_v16, %v4138_v16  ;;  %v4174_v33 = vpop.f32.mrb[19].mxu1  ;;  %v2925_v44 = vpack.c.bf16 %v4140_v17, %v4140_v17  ;;  %v2957_v45 = vpack.c.bf16 %v4144_v22, %v4144_v22  ;;  %v2928_v46 = vpack.c.bf16 %v4146_v23, %v4146_v23 }
 0x1a3   : > { %1269 = vst.msk [vmem:[%s3936_s9 + $0x48] sm:$0xf] %vm1250_vm1, %v2927_v31  ;;  %v2960_v47 = vpack.c.bf16 %v4156_v63, %v4156_v63  ;;  %v1495_v50 = vunpack.c.0.s8 %v1494_v39  ;;  %v2926_v51 = vpack.c.bf16 %v4158_v2, %v4158_v2  ;;  %v2958_v52 = vpack.c.bf16 %v4174_v33, %v4174_v33 }
 0x1a4   : > { %1413 = vst.msk [vmem:[%s3949_s14 + $0x48] sm:$0xf] %vm1250_vm1, %v2959_v32  ;;  %1267 = vst.msk [vmem:[%s3936_s9 + $0x40] sm:$0xf] %vm1250_vm1, %v2925_v44 }
 0x1a5   : > { %1411 = vst.msk [vmem:[%s3949_s14 + $0x40] sm:$0xf] %vm1250_vm1, %v2957_v45  ;;  %1270 = vst.msk [vmem:[%s3936_s9 + $0x4c] sm:$0xf] %vm1250_vm1, %v2928_v46  ;;  %v4249_v44 = vsub.s32 %v1495_v50, %v4021_v9 }
 0x1a6   : > { %1414 = vst.msk [vmem:[%s3949_s14 + $0x4c] sm:$0xf] %vm1250_vm1, %v2960_v47  ;;  %1268 = vst.msk [vmem:[%s3936_s9 + $0x44] sm:$0xf] %vm1250_vm1, %v2926_v51 }
 0x1a7   : > { %v4196_v48 = vpop.f32.mrb[20].mxu0  ;;  %v4212_v56 = vpop.f32.mrb[20].mxu1  ;;  %1412 = vst.msk [vmem:[%s3949_s14 + $0x44] sm:$0xf] %vm1250_vm1, %v2958_v52  ;;  %v4267_v9 = vrot.slane %v1627_v58, %v4249_v44  ;;  %v4273_v47 = vrot.slane %v1628_v0, %v4249_v44  ;;  %v4282_v34 = vrot.slane %v2075_v59, %v4249_v44  ;;  %v4299_v59 = vrot.slane %v1491_v5, %v4249_v44 }
 0x1a8   : > { %v2931_v53 = vpack.c.bf16 %v4196_v48, %v4196_v48  ;;  %v4214_v57 = vpop.f32.mrb[21].mxu0  ;;  %v2963_v60 = vpack.c.bf16 %v4212_v56, %v4212_v56  ;;  %v4220_v3 = vpop.f32.mrb[21].mxu1  ;;  %v4312_v35 = vrot.slane %v1492_v6, %v4249_v44  ;;  %v4327_v37 = vrot.slane %v1939_v7, %v4249_v44 }
 0x1a9   : > { %v2929_v61 = vpack.c.bf16 %v4214_v57, %v4214_v57  ;;  %v4222_v18 = vpop.f32.mrb[22].mxu0  ;;  %v2961_v19 = vpack.c.bf16 %v4220_v3, %v4220_v3  ;;  %v4234_v21 = vpop.f32.mrb[22].mxu1  ;;  %v4333_v55 = vrot.slane %v1940_v62, %v4249_v44  ;;  %v4345_v7 = vrot.slane %v1643_v24, %v4249_v44 }
 0x1aa   : > { %1273 = vst.msk [vmem:[%s3936_s9 + $0x58] sm:$0xf] %vm1250_vm1, %v2931_v53  ;;  %v2932_v20 = vpack.c.bf16 %v4222_v18, %v4222_v18  ;;  %v4236_v31 = vpop.f32.mrb[23].mxu0  ;;  %1417 = vst.msk [vmem:[%s3949_s14 + $0x58] sm:$0xf] %vm1250_vm1, %v2963_v60  ;;  %v2964_v32 = vpack.c.bf16 %v4234_v21, %v4234_v21  ;;  %v4246_v39 = vpop.f32.mrb[23].mxu1  ;;  %v4351_v38 = vrot.slane %v1644_v26, %v4249_v44 }
 0x1ab   : > { %1271 = vst.msk [vmem:[%s3936_s9 + $0x50] sm:$0xf] %vm1250_vm1, %v2929_v61  ;;  %v2930_v36 = vpack.c.bf16 %v4236_v31, %v4236_v31  ;;  %1415 = vst.msk [vmem:[%s3949_s14 + $0x50] sm:$0xf] %vm1250_vm1, %v2961_v19  ;;  %v2962_v45 = vpack.c.bf16 %v4246_v39, %v4246_v39  ;;  %v4357_v1 = vrot.slane %v2091_v27, %v4249_v44 }
 0x1ac   : > { %1274 = vst.msk [vmem:[%s3936_s9 + $0x5c] sm:$0xf] %vm1250_vm1, %v2932_v20  ;;  %1418 = vst.msk [vmem:[%s3949_s14 + $0x5c] sm:$0xf] %vm1250_vm1, %v2964_v32  ;;  %v4363_v62 = vrot.slane %v2092_v28, %v4249_v44 }
 0x1ad   : > { %1272 = vst.msk [vmem:[%s3936_s9 + $0x54] sm:$0xf] %vm1250_vm1, %v2930_v36  ;;  %1416 = vst.msk [vmem:[%s3949_s14 + $0x54] sm:$0xf] %vm1250_vm1, %v2962_v45 }
 0x1af   : > { %v3043_v46 = vpop.f32.mrb[24].mxu0  ;;  %v3079_v52 = vpop.f32.mrb[24].mxu1 }
 0x1b0   : > { %v2935_v50 = vpack.c.bf16 %v3043_v46, %v3043_v46  ;;  %v2809_v51 = vpack.c.bf16 %v3043_v46, %v4124_v11  ;;  %v738_v53 = vpop.f32.mrb[25].mxu0  ;;  %v2967_v60 = vpack.c.bf16 %v3079_v52, %v3079_v52  ;;  %v2857_v61 = vpack.c.bf16 %v3079_v52, %v4138_v16  ;;  %v1075_v20 = vpop.f32.mrb[25].mxu1 }
 0x1b1   : > { %v2933_v19 = vpack.c.bf16 %v738_v53, %v738_v53  ;;  %v2801_v58 = vpack.c.bf16 %v738_v53, %v4140_v17  ;;  %v3044_v32 = vpop.f32.mrb[26].mxu0  ;;  %v2965_v49 = vpack.c.bf16 %v1075_v20, %v1075_v20  ;;  %v2849_v0 = vpack.c.bf16 %v1075_v20, %v4144_v22  ;;  %v3080_v16 = vpop.f32.mrb[26].mxu1 }
 0x1b2   : > { %1277 = vst.msk [vmem:[%s3936_s9 + $0x68] sm:$0xf] %vm1250_vm1, %v2935_v50  ;;  %v2936_v11 = vpack.c.bf16 %v3044_v32, %v3044_v32  ;;  %v4287_v36 = vpop.f32.mrb[27].mxu0  ;;  %v4293_v17 = vrot.slane %v2076_v4, %v4249_v44  ;;  %1421 = vst.msk [vmem:[%s3949_s14 + $0x68] sm:$0xf] %vm1250_vm1, %v2967_v60  ;;  %v2810_v22 = vpack.c.bf16 %v3044_v32, %v4146_v23  ;;  %v4306_v46 = vpop.f32.mrb[27].mxu1 }
 0x1b3   : > { %1275 = vst.msk [vmem:[%s3936_s9 + $0x60] sm:$0xf] %vm1250_vm1, %v2933_v19  ;;  %v2968_v45 = vpack.c.bf16 %v3080_v16, %v3080_v16  ;;  %1419 = vst.msk [vmem:[%s3949_s14 + $0x60] sm:$0xf] %vm1250_vm1, %v2965_v49  ;;  %v2858_v54 = vpack.c.bf16 %v3080_v16, %v4156_v63  ;;  %v2934_v4 = vpack.c.bf16 %v4287_v36, %v4287_v36 }
 0x1b4   : > { %1278 = vst.msk [vmem:[%s3936_s9 + $0x6c] sm:$0xf] %vm1250_vm1, %v2936_v11  ;;  %v2966_v6 = vpack.c.bf16 %v4306_v46, %v4306_v46  ;;  %v1603_v24 = vrot.slane %v2809_v51, %v4036_v25  ;;  %v2051_v8 = vrot.slane %v2857_v61, %v4036_v25  ;;  %v1467_v14 = vrot.slane %v2801_v58, %v4036_v25 }
 0x1b5   : > { %1422 = vst.msk [vmem:[%s3949_s14 + $0x6c] sm:$0xf] %vm1250_vm1, %v2968_v45  ;;  %1276 = vst.msk [vmem:[%s3936_s9 + $0x64] sm:$0xf] %vm1250_vm1, %v2934_v4  ;;  %v4371_v26 = vrot.slane %v2849_v0, %v4036_v25  ;;  %v4376_v63 = vrot.slane %v2810_v22, %v4036_v25  ;;  %v4379_v10 = vrot.slane %v2858_v54, %v4036_v25 }
 0x1b6   : > { %1420 = vst.msk [vmem:[%s3949_s14 + $0x64] sm:$0xf] %vm1250_vm1, %v2966_v6 }
 0x1b7   : > { %v3047_v27 = vpop.f32.mrb[28].mxu0  ;;  %v3083_v50 = vpop.f32.mrb[28].mxu1 }
 0x1b8   : > { %v2939_v15 = vpack.c.bf16 %v3047_v27, %v3047_v27  ;;  %v2811_v28 = vpack.c.bf16 %v3047_v27, %v4196_v48  ;;  %v754_v51 = vpop.f32.mrb[29].mxu0  ;;  %v2971_v52 = vpack.c.bf16 %v3083_v50, %v3083_v50  ;;  %v2859_v53 = vpack.c.bf16 %v3083_v50, %v4212_v56  ;;  %v1091_v19 = vpop.f32.mrb[29].mxu1 }
 0x1b9   : > { %v2937_v60 = vpack.c.bf16 %v754_v51, %v754_v51  ;;  %v2803_v61 = vpack.c.bf16 %v754_v51, %v4214_v57  ;;  %v3048_v58 = vpop.f32.mrb[30].mxu0  ;;  %v2969_v32 = vpack.c.bf16 %v1091_v19, %v1091_v19  ;;  %v2851_v48 = vpack.c.bf16 %v1091_v19, %v4220_v3  ;;  %v3084_v0 = vpop.f32.mrb[30].mxu1 }
 0x1ba   : > { %1281 = vst.msk [vmem:[%s3936_s9 + $0x78] sm:$0xf] %vm1250_vm1, %v2939_v15  ;;  %v1619_v20 = vrot.slane %v2811_v28, %v4036_v25  ;;  %v2940_v49 = vpack.c.bf16 %v3048_v58, %v3048_v58  ;;  %v4388_v11 = vpop.f32.mrb[31].mxu0  ;;  %1425 = vst.msk [vmem:[%s3949_s14 + $0x78] sm:$0xf] %vm1250_vm1, %v2971_v52  ;;  %v2067_v56 = vrot.slane %v2859_v53, %v4036_v25  ;;  %v4397_v45 = vpop.f32.mrb[31].mxu1 }
 0x1bb   : > { %1279 = vst.msk [vmem:[%s3936_s9 + $0x70] sm:$0xf] %vm1250_vm1, %v2937_v60  ;;  %v1483_v57 = vrot.slane %v2803_v61, %v4036_v25  ;;  %v2812_v16 = vpack.c.bf16 %v3048_v58, %v4222_v18  ;;  %v2972_v22 = vpack.c.bf16 %v3084_v0, %v3084_v0  ;;  %1423 = vst.msk [vmem:[%s3949_s14 + $0x70] sm:$0xf] %vm1250_vm1, %v2969_v32 }
 0x1bc   : > { %v1659_v54 = vcombine.low %v1603_v24, %v1619_v20  ;;  %v1660_v3 = vcombine.high %v1603_v24, %v1619_v20  ;;  %v1931_v4 = vrot.slane %v2851_v48, %v4036_v25  ;;  %1282 = vst.msk [vmem:[%s3936_s9 + $0x7c] sm:$0xf] %vm1250_vm1, %v2940_v49  ;;  %v2860_v6 = vpack.c.bf16 %v3084_v0, %v4234_v21 }
 0x1bd   : > { %v2107_v27 = vcombine.low %v2051_v8, %v2067_v56  ;;  %v2108_v15 = vcombine.high %v2051_v8, %v2067_v56  ;;  %v1523_v28 = vcombine.low %v1467_v14, %v1483_v57  ;;  %v1524_v50 = vcombine.high %v1467_v14, %v1483_v57  ;;  %1426 = vst.msk [vmem:[%s3949_s14 + $0x7c] sm:$0xf] %vm1250_vm1, %v2972_v22 }
 0x1be   : > { %v1667_v18 = vrot.slane %v1659_v54, %v4249_v44  ;;  %v1674_v51 = vrot.slane %v1660_v3, %v4249_v44  ;;  %v1971_v24 = vcombine.low %v4371_v26, %v1931_v4  ;;  %v1972_v52 = vcombine.high %v4371_v26, %v1931_v4 }
 0x1bf   : > { %v2115_v53 = vrot.slane %v2107_v27, %v4249_v44  ;;  %v2122_v60 = vrot.slane %v2108_v15, %v4249_v44  ;;  %v1531_v21 = vrot.slane %v1523_v28, %v4249_v44  ;;  %v1538_v8 = vrot.slane %v1524_v50, %v4249_v44 }
 0x1c0   : > { %v1691_v14 = vcombine.low %v4267_v9, %v1667_v18  ;;  %v1692_v61 = vcombine.high %v4267_v9, %v1667_v18  ;;  %v1693_v19 = vcombine.low %v4273_v47, %v1674_v51  ;;  %v1694_v58 = vcombine.high %v4273_v47, %v1674_v51 }
 0x1c1   : > { %v4420_v20 = vcombine.low %v4282_v34, %v2115_v53  ;;  %v4423_v26 = vcombine.high %v4282_v34, %v2115_v53  ;;  %v4426_v32 = vcombine.low %v4293_v17, %v2122_v60  ;;  %v4429_v48 = vcombine.high %v4293_v17, %v2122_v60 }
 0x1c2   : > { %v1703_v49 = vshrl.u32 %v1691_v14, 16  ;;  %v1709_v0 = vshrl.u32 %v1692_v61, 16  ;;  %v1715_v56 = vshrl.u32 %v1693_v19, 16  ;;  %v1721_v9 = vshrl.u32 %v1694_v58, 16 }
 0x1c3   : > { %v2151_v57 = vshrl.u32 %v4420_v20, 16  ;;  %v2157_v47 = vshrl.u32 %v4423_v26, 16  ;;  %v2163_v22 = vshrl.u32 %v4426_v32, 16  ;;  %v1555_v34 = vcombine.low %v4299_v59, %v1531_v21 }
 0x1c4   : > { %v1556_v3 = vcombine.high %v4299_v59, %v1531_v21  ;;  %v1557_v4 = vcombine.low %v4312_v35, %v1538_v8  ;;  %v1558_v17 = vcombine.high %v4312_v35, %v1538_v8  ;;  %v1979_v27 = vrot.slane %v1971_v24, %v4249_v44 }
 0x1c5   : > { %v1986_v15 = vrot.slane %v1972_v52, %v4249_v44  ;;  %v4442_v28 = vrot.slane %v2812_v16, %v4036_v25  ;;  %v4445_v50 = vrot.slane %v2860_v6, %v4036_v25  ;;  %v1701_v18 = vpack.i.b16 %v1691_v14, %v1555_v34 }
 0x1c6   : > { %v1702_v51 = vshrl.u32 %v1555_v34, 16  ;;  %v1707_v53 = vpack.i.b16 %v1692_v61, %v1556_v3  ;;  %v1708_v60 = vshrl.u32 %v1556_v3, 16  ;;  %v1713_v43 = vpack.i.b16 %v1693_v19, %v1557_v4 }
 0x1c7   : > { %v1714_v59 = vshrl.u32 %v1557_v4, 16  ;;  %v1719_v21 = vpack.i.b16 %v1694_v58, %v1558_v17  ;;  %v1720_v42 = vshrl.u32 %v1558_v17, 16  ;;  %v2813_v24 = vcombine.low %v1701_v18, %v1701_v18 }
 0x1c8   : > { %v1704_v35 = vpack.i.b16 %v1703_v49, %v1702_v51  ;;  %v1710_v8 = vpack.i.b16 %v1709_v0, %v1708_v60  ;;  %v2814_v41 = vcombine.high %v1701_v18, %v1701_v18  ;;  %v2817_v16 = vcombine.low %v1707_v53, %v1707_v53 }
 0x1c9   : > { %v1716_v52 = vpack.i.b16 %v1715_v56, %v1714_v59  ;;  %v1722_v40 = vpack.i.b16 %v1721_v9, %v1720_v42  ;;  %v2818_v23 = vcombine.high %v1707_v53, %v1707_v53  ;;  %1843 = vst.msk [vmem:[%s4448_s23] sm:$0xf] %vm1250_vm1, %v2813_v24  ;;  %v2821_v42 = vcombine.low %v1713_v43, %v1713_v43 }
 0x1ca   : > { %v2815_v5 = vcombine.low %v1704_v35, %v1704_v35  ;;  %v2816_v6 = vcombine.high %v1704_v35, %v1704_v35  ;;  %v2819_v54 = vcombine.low %v1710_v8, %v1710_v8  ;;  %v2820_v14 = vcombine.high %v1710_v8, %v1710_v8  ;;  %1844 = vst.msk [vmem:[%s4448_s23 + $0x4] sm:$0xf] %vm1250_vm1, %v2814_v41 }
 0x1cb   : > { %v2822_v61 = vcombine.high %v1713_v43, %v1713_v43  ;;  %v2823_v19 = vcombine.low %v1716_v52, %v1716_v52  ;;  %v2824_v58 = vcombine.high %v1716_v52, %v1716_v52  ;;  %1847 = vst.msk [vmem:[%s4448_s23 + $0x10] sm:$0xf] %vm1250_vm1, %v2817_v16  ;;  %1848 = vst.msk [vmem:[%s4448_s23 + $0x14] sm:$0xf] %vm1250_vm1, %v2818_v23  ;;  %v4976_v60 = vshrl.u32 %v4429_v48, 16 }
 0x1cc   : > { %v2825_v49 = vcombine.low %v1719_v21, %v1719_v21  ;;  %v2826_v0 = vcombine.high %v1719_v21, %v1719_v21  ;;  %v2827_v56 = vcombine.low %v1722_v40, %v1722_v40  ;;  %v2828_v9 = vcombine.high %v1722_v40, %v1722_v40  ;;  %1845 = vst.msk [vmem:[%s4448_s23 + $0x8] sm:$0xf] %vm1250_vm1, %v2815_v5 }
 0x1cd   : > { %1846 = vst.msk [vmem:[%s4448_s23 + $0xc] sm:$0xf] %vm1250_vm1, %v2816_v6  ;;  %1849 = vst.msk [vmem:[%s4448_s23 + $0x18] sm:$0xf] %vm1250_vm1, %v2819_v54  ;;  %v2003_v41 = vcombine.low %v4327_v37, %v1979_v27  ;;  %v2004_v40 = vcombine.high %v4327_v37, %v1979_v27  ;;  %v2005_v43 = vcombine.low %v4333_v55, %v1986_v15 }
 0x1ce   : > { %1850 = vst.msk [vmem:[%s4448_s23 + $0x1c] sm:$0xf] %vm1250_vm1, %v2820_v14  ;;  %1851 = vst.msk [vmem:[%s4448_s23 + $0x20] sm:$0xf] %vm1250_vm1, %v2821_v42  ;;  %v2006_v5 = vcombine.high %v4333_v55, %v1986_v15  ;;  %v1675_v23 = vcombine.low %v4376_v63, %v4442_v28  ;;  %v1676_v54 = vcombine.high %v4376_v63, %v4442_v28 }
 0x1cf   : > { %1852 = vst.msk [vmem:[%s4448_s23 + $0x24] sm:$0xf] %vm1250_vm1, %v2822_v61  ;;  %1853 = vst.msk [vmem:[%s4448_s23 + $0x28] sm:$0xf] %vm1250_vm1, %v2823_v19  ;;  %v2123_v37 = vcombine.low %v4379_v10, %v4445_v50  ;;  %v2124_v55 = vcombine.high %v4379_v10, %v4445_v50  ;;  %v2149_v34 = vpack.i.b16 %v4420_v20, %v2003_v41  ;;  %v2150_v3 = vshrl.u32 %v2003_v41, 16 }
 0x1d0   : > { %1854 = vst.msk [vmem:[%s4448_s23 + $0x2c] sm:$0xf] %vm1250_vm1, %v2824_v58  ;;  %1855 = vst.msk [vmem:[%s4448_s23 + $0x30] sm:$0xf] %vm1250_vm1, %v2825_v49  ;;  %v2155_v4 = vpack.i.b16 %v4423_v26, %v2004_v40  ;;  %v2156_v17 = vshrl.u32 %v2004_v40, 16  ;;  %v2161_v27 = vpack.i.b16 %v4426_v32, %v2005_v43  ;;  %v2162_v15 = vshrl.u32 %v2005_v43, 16 }
 0x1d1   : > { %1856 = vst.msk [vmem:[%s4448_s23 + $0x34] sm:$0xf] %vm1250_vm1, %v2826_v0  ;;  %1857 = vst.msk [vmem:[%s4448_s23 + $0x38] sm:$0xf] %vm1250_vm1, %v2827_v56  ;;  %v2167_v18 = vpack.i.b16 %v4429_v48, %v2006_v5  ;;  %v2168_v51 = vshrl.u32 %v2006_v5, 16  ;;  %v2152_v63 = vpack.i.b16 %v2151_v57, %v2150_v3  ;;  %v2861_v10 = vcombine.low %v2149_v34, %v2149_v34 }
 0x1d2   : > { %1858 = vst.msk [vmem:[%s4448_s23 + $0x3c] sm:$0xf] %vm1250_vm1, %v2828_v9  ;;  %v2158_v28 = vpack.i.b16 %v2157_v47, %v2156_v17  ;;  %v2862_v50 = vcombine.high %v2149_v34, %v2149_v34  ;;  %v2164_v53 = vpack.i.b16 %v2163_v22, %v2162_v15  ;;  %v2865_v21 = vcombine.low %v2155_v4, %v2155_v4 }
 0x1d3   : > { %v2170_v59 = vpack.i.b16 %v4976_v60, %v2168_v51  ;;  %v2866_v35 = vcombine.high %v2155_v4, %v2155_v4  ;;  %v2863_v8 = vcombine.low %v2152_v63, %v2152_v63  ;;  %v2864_v24 = vcombine.high %v2152_v63, %v2152_v63  ;;  %2291 = vst.msk [vmem:[%s4507_s18] sm:$0xf] %vm1250_vm1, %v2861_v10 }
 0x1d4   : > { %v2867_v52 = vcombine.low %v2158_v28, %v2158_v28  ;;  %v2868_v20 = vcombine.high %v2158_v28, %v2158_v28  ;;  %2292 = vst.msk [vmem:[%s4507_s18 + $0x4] sm:$0xf] %vm1250_vm1, %v2862_v50  ;;  %v2869_v26 = vcombine.low %v2161_v27, %v2161_v27  ;;  %v2870_v32 = vcombine.high %v2161_v27, %v2161_v27 }
 0x1d5   : > { %v2871_v48 = vcombine.low %v2164_v53, %v2164_v53  ;;  %v2872_v57 = vcombine.high %v2164_v53, %v2164_v53  ;;  %2295 = vst.msk [vmem:[%s4507_s18 + $0x10] sm:$0xf] %vm1250_vm1, %v2865_v21  ;;  %2296 = vst.msk [vmem:[%s4507_s18 + $0x14] sm:$0xf] %vm1250_vm1, %v2866_v35  ;;  %v2873_v47 = vcombine.low %v2167_v18, %v2167_v18 }
 0x1d6   : > { %v2874_v22 = vcombine.high %v2167_v18, %v2167_v18  ;;  %v2875_v16 = vcombine.low %v2170_v59, %v2170_v59  ;;  %v2876_v6 = vcombine.high %v2170_v59, %v2170_v59  ;;  %2293 = vst.msk [vmem:[%s4507_s18 + $0x8] sm:$0xf] %vm1250_vm1, %v2863_v8  ;;  %2294 = vst.msk [vmem:[%s4507_s18 + $0xc] sm:$0xf] %vm1250_vm1, %v2864_v24 }
 0x1d7   : > { %2297 = vst.msk [vmem:[%s4507_s18 + $0x18] sm:$0xf] %vm1250_vm1, %v2867_v52  ;;  %2298 = vst.msk [vmem:[%s4507_s18 + $0x1c] sm:$0xf] %vm1250_vm1, %v2868_v20  ;;  %v1683_v14 = vrot.slane %v1675_v23, %v4249_v44  ;;  %v1690_v42 = vrot.slane %v1676_v54, %v4249_v44  ;;  %v2131_v61 = vrot.slane %v2123_v37, %v4249_v44 }
 0x1d8   : > { %2299 = vst.msk [vmem:[%s4507_s18 + $0x20] sm:$0xf] %vm1250_vm1, %v2869_v26  ;;  %2300 = vst.msk [vmem:[%s4507_s18 + $0x24] sm:$0xf] %vm1250_vm1, %v2870_v32  ;;  %v2138_v19 = vrot.slane %v2124_v55, %v4249_v44  ;;  %v2938_v58 = vpack.c.bf16 %v4388_v11, %v4388_v11  ;;  %v2804_v49 = vpack.c.bf16 %v4388_v11, %v4236_v31 }
 0x1d9   : > { %2301 = vst.msk [vmem:[%s4507_s18 + $0x28] sm:$0xf] %vm1250_vm1, %v2871_v48  ;;  %2302 = vst.msk [vmem:[%s4507_s18 + $0x2c] sm:$0xf] %vm1250_vm1, %v2872_v57  ;;  %v2970_v0 = vpack.c.bf16 %v4397_v45, %v4397_v45  ;;  %v2852_v56 = vpack.c.bf16 %v4397_v45, %v4246_v39  ;;  %v4566_v9 = vcombine.low %v4345_v7, %v1683_v14 }
 0x1da   : > { %2303 = vst.msk [vmem:[%s4507_s18 + $0x30] sm:$0xf] %vm1250_vm1, %v2873_v47  ;;  %2304 = vst.msk [vmem:[%s4507_s18 + $0x34] sm:$0xf] %vm1250_vm1, %v2874_v22  ;;  %v4569_v31 = vcombine.high %v4345_v7, %v1683_v14  ;;  %v4572_v11 = vcombine.low %v4351_v38, %v1690_v42  ;;  %v4575_v39 = vcombine.high %v4351_v38, %v1690_v42 }
 0x1db   : > { %2305 = vst.msk [vmem:[%s4507_s18 + $0x38] sm:$0xf] %vm1250_vm1, %v2875_v16  ;;  %2306 = vst.msk [vmem:[%s4507_s18 + $0x3c] sm:$0xf] %vm1250_vm1, %v2876_v6  ;;  %v4578_v45 = vcombine.low %v4357_v1, %v2131_v61  ;;  %v4581_v41 = vcombine.high %v4357_v1, %v2131_v61  ;;  %v4584_v40 = vcombine.low %v4363_v62, %v2138_v19 }
 0x1dc   : > { %v4587_v43 = vcombine.high %v4363_v62, %v2138_v19  ;;  %1280 = vst.msk [vmem:[%s3936_s9 + $0x74] sm:$0xf] %vm1250_vm1, %v2938_v58  ;;  %1424 = vst.msk [vmem:[%s3949_s14 + $0x74] sm:$0xf] %vm1250_vm1, %v2970_v0 }
 0x1dd   : > { %3359 = shalt.err (!%p3356_p7)
}
 0x1de   : > { %s3360_s13 = scalar_lea.hbm %s4561_s21, 2048  ;;  %s3364_s12 = scalar_lea.hbm %s4935_s4, 4096 }
 0x1df   : > { %p3361_p12 = scmp.ne.s32.totalorder %s4561_s21, %s3360_s13  ;;  %p3365_p11 = scmp.lt.u32.totalorder %s4561_s21, %s4935_s4 }
 0x1e0   : > { %p3366_p13 = scmp.lt.u32.totalorder %s3364_s12, %s3360_s13  ;;  %p3368_p2 = scmp.lt.u32.totalorder %s3360_s13, %s4561_s21 }
 0x1e1   : > { %p3362_p1 = pnand %p3361_p12, %p4977_p6 }
 0x1e2   : > { %p3367_p0 = por %p3366_p13, %p3365_p11 }
 0x1e3   : > { %p3363_p8 = pneg %p3362_p1 }
 0x1e4   : > { %p3369_p10 = por %p3368_p2, %p3367_p0 }
 0x1e6   : > { %p3370_p3 = pnand %p3369_p10, %p3363_p8 }
 0x1e8   : > { %3373 = shalt.err (!%p3370_p3)
}
 0x1e9   : > { %s3543_s27 = smov 64   ;;  %s3544_s3 = smov 4   ;;  %v4978_v7 = vpack.c.bf16 %v4287_v36, %v4158_v2  ;;  %v4979_v1 = vpack.c.bf16 %v4306_v46, %v4174_v33  ;;  %v1490_v5 = vrot.slane %v2804_v49, %v4036_v25  ;;  %v1938_v23 = vrot.slane %v2852_v56, %v4036_v25 }
 0x1ea   : > { %3097 = dma.vmem_to_hbm [thread:$0]  (%p4977_p6), %s4563_s17, 2048, %s4561_s21, %s2324_s28, %s3543_s27, %s3543_s27, %s3544_s3   ;;  %v4980_v54 = vcombine.low %v4127_v12, %v4163_v29  ;;  %v4981_v55 = vcombine.high %v4127_v12, %v4163_v29  ;;  %v4982_v36 = vcombine.low %v4130_v13, %v4168_v30  ;;  %v4983_v46 = vcombine.high %v4130_v13, %v4168_v30 }
 0x1eb   : > { %v1474_v38 = vrot.slane %v4978_v7, %v4036_v25  ;;  %v1922_v62 = vrot.slane %v4979_v1, %v4036_v25  ;;  %v1727_v27 = vshrl.u32 %v4566_v9, 16  ;;  %v1733_v15 = vshrl.u32 %v4569_v31, 16  ;;  %s2373_s17 = sshll.u32 %s4448_s23, 4  ;;  %s2392_s21 = sshll.u32 %s3949_s14, 4  ;;  %s4694_s17 = int_to_ptr.vmem [resolvable:$true] %s2373_s17  ;;  %s4720_s21 = int_to_ptr.vmem [resolvable:$true] %s2392_s21 }
 0x1ec   : > { %v1515_v37 = vrot.slane %v4980_v54, %v4249_v44  ;;  %v1522_v2 = vrot.slane %v4981_v55, %v4249_v44  ;;  %v1963_v33 = vrot.slane %v4982_v36, %v4249_v44  ;;  %v1970_v25 = vrot.slane %v4983_v46, %v4249_v44  ;;  %s4692_s15 = scalar_lea.hbm %s4936_s5, %s4518_s10  ;;  %s4718_s0 = scalar_lea.hbm %s4937_s6, %s4518_s10 }
 0x1ed   : > { %v1539_v34 = vcombine.low %v1474_v38, %v1490_v5  ;;  %v1540_v3 = vcombine.high %v1474_v38, %v1490_v5  ;;  %v1987_v4 = vcombine.low %v1922_v62, %v1938_v23  ;;  %v1988_v17 = vcombine.high %v1922_v62, %v1938_v23  ;;  %s2410_s13 = sshll.u32 %s4507_s18, 4  ;;  %s3374_s20 = scalar_lea.vmem %s4694_s17, 2048  ;;  %s4861_s13 = int_to_ptr.vmem [resolvable:$true] %s2410_s13 }
 0x1ee   : > { %v1739_v12 = vshrl.u32 %v4572_v11, 16  ;;  %v1745_v29 = vshrl.u32 %v4575_v39, 16  ;;  %v2175_v30 = vshrl.u32 %v4578_v45, 16  ;;  %v2181_v28 = vshrl.u32 %v4581_v41, 16  ;;  %p3375_p4 = scmp.ne.s32.totalorder %s4694_s17, %s3374_s20  ;;  %s3545_s22 = smov [#allocation11]  }
 0x1ef   : > { %v1547_v18 = vrot.slane %v1539_v34, %v4249_v44  ;;  %v1554_v51 = vrot.slane %v1540_v3, %v4249_v44  ;;  %v1995_v63 = vrot.slane %v1987_v4, %v4249_v44  ;;  %v2002_v13 = vrot.slane %v1988_v17, %v4249_v44  ;;  %s3378_s12 = sshll.u32 %s3545_s22, 4  ;;  %s3379_s12 = int_to_ptr.vmem [resolvable:$false] %s3378_s12 }
 0x1f0   : > { %v2187_v10 = vshrl.u32 %v4584_v40, 16  ;;  %v2193_v50 = vshrl.u32 %v4587_v43, 16  ;;  %p3376_p9 = pnand %p3375_p4, %p4977_p6  ;;  %s3380_s2 = scalar_lea.vmem %s3379_s12, 4096 }
 0x1f1   : > { %v1559_v53 = vcombine.low %v1515_v37, %v1547_v18  ;;  %v1560_v60 = vcombine.high %v1515_v37, %v1547_v18  ;;  %v1561_v59 = vcombine.low %v1522_v2, %v1554_v51  ;;  %v1562_v21 = vcombine.high %v1522_v2, %v1554_v51  ;;  %p3381_p7 = scmp.lt.s32.totalorder %s4694_s17, %s3379_s12  ;;  %p3382_p12 = scmp.lt.s32.totalorder %s3380_s2, %s3374_s20 }
 0x1f2   : > { %v4658_v35 = vcombine.low %v1963_v33, %v1995_v63  ;;  %v4660_v8 = vcombine.high %v1963_v33, %v1995_v63  ;;  %v4662_v24 = vcombine.low %v1970_v25, %v2002_v13  ;;  %v4664_v52 = vcombine.high %v1970_v25, %v2002_v13  ;;  %p3377_p5 = pneg %p3376_p9 }
 0x1f3   : > { %v1725_v44 = vpack.i.b16 %v4566_v9, %v1559_v53  ;;  %v1726_v20 = vshrl.u32 %v1559_v53, 16  ;;  %v1731_v26 = vpack.i.b16 %v4569_v31, %v1560_v60  ;;  %v1732_v32 = vshrl.u32 %v1560_v60, 16  ;;  %p3383_p1 = por %p3382_p12, %p3381_p7 }
 0x1f4   : > { %v1737_v48 = vpack.i.b16 %v4572_v11, %v1561_v59  ;;  %v1738_v57 = vshrl.u32 %v1561_v59, 16  ;;  %v1743_v47 = vpack.i.b16 %v4575_v39, %v1562_v21  ;;  %v1744_v22 = vshrl.u32 %v1562_v21, 16 }
 0x1f5   : > { %v1728_v16 = vpack.i.b16 %v1727_v27, %v1726_v20  ;;  %v1734_v6 = vpack.i.b16 %v1733_v15, %v1732_v32  ;;  %v2829_v14 = vcombine.low %v1725_v44, %v1725_v44  ;;  %v2830_v42 = vcombine.high %v1725_v44, %v1725_v44  ;;  %p3384_p8 = pnand %p3383_p1, %p3377_p5 }
 0x1f6   : > { %v1740_v61 = vpack.i.b16 %v1739_v12, %v1738_v57  ;;  %v1746_v19 = vpack.i.b16 %v1745_v29, %v1744_v22  ;;  %v2833_v58 = vcombine.low %v1731_v26, %v1731_v26  ;;  %v2834_v49 = vcombine.high %v1731_v26, %v1731_v26 }
 0x1f7   : > { %v2831_v0 = vcombine.low %v1728_v16, %v1728_v16  ;;  %v2832_v56 = vcombine.high %v1728_v16, %v1728_v16  ;;  %v2835_v9 = vcombine.low %v1734_v6, %v1734_v6  ;;  %v2836_v31 = vcombine.high %v1734_v6, %v1734_v6  ;;  %1859 = vst.msk [vmem:[%s4448_s23 + $0x40] sm:$0xf] %vm1250_vm1, %v2829_v14 }
 0x1f8   : > { %1860 = vst.msk [vmem:[%s4448_s23 + $0x44] sm:$0xf] %vm1250_vm1, %v2830_v42  ;;  %v2837_v11 = vcombine.low %v1737_v48, %v1737_v48  ;;  %v2838_v39 = vcombine.high %v1737_v48, %v1737_v48  ;;  %v2839_v7 = vcombine.low %v1740_v61, %v1740_v61  ;;  %v2840_v38 = vcombine.high %v1740_v61, %v1740_v61 }
 0x1f9   : > { %1863 = vst.msk [vmem:[%s4448_s23 + $0x50] sm:$0xf] %vm1250_vm1, %v2833_v58  ;;  %1864 = vst.msk [vmem:[%s4448_s23 + $0x54] sm:$0xf] %vm1250_vm1, %v2834_v49  ;;  %v2841_v1 = vcombine.low %v1743_v47, %v1743_v47  ;;  %v2842_v62 = vcombine.high %v1743_v47, %v1743_v47  ;;  %v2843_v5 = vcombine.low %v1746_v19, %v1746_v19  ;;  %v2174_v37 = vshrl.u32 %v4658_v35, 16 }
 0x1fa   : > { %v2844_v23 = vcombine.high %v1746_v19, %v1746_v19  ;;  %1861 = vst.msk [vmem:[%s4448_s23 + $0x48] sm:$0xf] %vm1250_vm1, %v2831_v0  ;;  %1862 = vst.msk [vmem:[%s4448_s23 + $0x4c] sm:$0xf] %vm1250_vm1, %v2832_v56  ;;  %v4706_v54 = vpack.i.b16 %v4578_v45, %v4658_v35  ;;  %v4711_v55 = vpack.i.b16 %v4581_v41, %v4660_v8  ;;  %v2180_v2 = vshrl.u32 %v4660_v8, 16 }
 0x1fb   : > { %1865 = vst.msk [vmem:[%s4448_s23 + $0x58] sm:$0xf] %vm1250_vm1, %v2835_v9  ;;  %1866 = vst.msk [vmem:[%s4448_s23 + $0x5c] sm:$0xf] %vm1250_vm1, %v2836_v31  ;;  %v4732_v36 = vpack.i.b16 %v4584_v40, %v4662_v24  ;;  %v2186_v33 = vshrl.u32 %v4662_v24, 16  ;;  %v4737_v46 = vpack.i.b16 %v4587_v43, %v4664_v52  ;;  %v2192_v25 = vshrl.u32 %v4664_v52, 16 }
 0x1fc   : > { %1867 = vst.msk [vmem:[%s4448_s23 + $0x60] sm:$0xf] %vm1250_vm1, %v2837_v11  ;;  %1868 = vst.msk [vmem:[%s4448_s23 + $0x64] sm:$0xf] %vm1250_vm1, %v2838_v39  ;;  %v4743_v34 = vpack.i.b16 %v2175_v30, %v2174_v37  ;;  %v4747_v3 = vpack.i.b16 %v2181_v28, %v2180_v2  ;;  %v2877_v4 = vcombine.low %v4706_v54, %v4706_v54 }
 0x1fd   : > { %1869 = vst.msk [vmem:[%s4448_s23 + $0x68] sm:$0xf] %vm1250_vm1, %v2839_v7  ;;  %1870 = vst.msk [vmem:[%s4448_s23 + $0x6c] sm:$0xf] %vm1250_vm1, %v2840_v38  ;;  %v2878_v17 = vcombine.high %v4706_v54, %v4706_v54 }
 0x1fe   : > { %1871 = vst.msk [vmem:[%s4448_s23 + $0x70] sm:$0xf] %vm1250_vm1, %v2841_v1  ;;  %1872 = vst.msk [vmem:[%s4448_s23 + $0x74] sm:$0xf] %vm1250_vm1, %v2842_v62 }
 0x1ff   : > { %1873 = vst.msk [vmem:[%s4448_s23 + $0x78] sm:$0xf] %vm1250_vm1, %v2843_v5  ;;  %1874 = vst.msk [vmem:[%s4448_s23 + $0x7c] sm:$0xf] %vm1250_vm1, %v2844_v23  ;;  %s4755_s23 = scalar_lea.sflag [#allocation12], %s361_s11 }
 0x200   : > { %3387 = shalt.err (!%p3384_p8)
}
 0x201   : > { %s3388_s30 = scalar_lea.hbm %s4692_s15, 2048  ;;  %s3392_s14 = scalar_lea.hbm %s4936_s5, 4096 }
 0x202   : > { %p3389_p11 = scmp.ne.s32.totalorder %s4692_s15, %s3388_s30  ;;  %p3393_p2 = scmp.lt.u32.totalorder %s4692_s15, %s4936_s5 }
 0x203   : > { %p3394_p10 = scmp.lt.u32.totalorder %s3392_s14, %s3388_s30  ;;  %p3396_p4 = scmp.lt.u32.totalorder %s3388_s30, %s4692_s15 }
 0x204   : > { %p3390_p13 = pnand %p3389_p11, %p4977_p6 }
 0x205   : > { %p3395_p3 = por %p3394_p10, %p3393_p2 }
 0x206   : > { %p3391_p0 = pneg %p3390_p13 }
 0x207   : > { %p3397_p9 = por %p3396_p4, %p3395_p3 }
 0x209   : > { %p3398_p5 = pnand %p3397_p9, %p3391_p0 }
 0x20b   : > { %3401 = shalt.err (!%p3398_p5)
}
 0x20c   : > { %3098 = dma.vmem_to_hbm [thread:$0]  (%p4977_p6), %s4694_s17, 2048, %s4692_s15, %s4755_s23, %s3543_s27, %s3543_s27, %s3544_s3   ;;  %v2188_v45 = vpack.i.b16 %v2187_v10, %v2186_v33  ;;  %v2194_v41 = vpack.i.b16 %v2193_v50, %v2192_v25  ;;  %v2881_v27 = vcombine.low %v4711_v55, %v4711_v55  ;;  %v2882_v15 = vcombine.high %v4711_v55, %v4711_v55 }
 0x20d   : > { %s3402_s8 = scalar_lea.vmem %s4720_s21, 2048  ;;  %s3546_s20 = smov [#allocation13]  }
 0x20e   : > { %p3403_p7 = scmp.ne.s32.totalorder %s4720_s21, %s3402_s8  ;;  %s3406_s22 = sshll.u32 %s3546_s20, 4  ;;  %s3407_s22 = int_to_ptr.vmem [resolvable:$false] %s3406_s22 }
 0x20f   : > { %s3408_s17 = scalar_lea.vmem %s3407_s22, 4096  ;;  %p3409_p8 = scmp.lt.s32.totalorder %s4720_s21, %s3407_s22 }
 0x210   : > { %p3404_p12 = pnand %p3403_p7, %p4977_p6  ;;  %p3410_p11 = scmp.lt.s32.totalorder %s3408_s17, %s3402_s8 }
 0x212   : > { %p3405_p1 = pneg %p3404_p12  ;;  %p3411_p13 = por %p3410_p11, %p3409_p8 }
 0x214   : > { %p3412_p0 = pnand %p3411_p13, %p3405_p1 }
 0x216   : > { %3415 = shalt.err (!%p3412_p0)
}
 0x217   : > { %s3416_s15 = scalar_lea.hbm %s4718_s0, 2048  ;;  %s3420_s30 = scalar_lea.hbm %s4937_s6, 4096 }
 0x218   : > { %p3417_p2 = scmp.ne.s32.totalorder %s4718_s0, %s3416_s15  ;;  %p3421_p4 = scmp.lt.u32.totalorder %s4718_s0, %s4937_s6 }
 0x219   : > { %p3422_p9 = scmp.lt.u32.totalorder %s3420_s30, %s3416_s15  ;;  %p3424_p7 = scmp.lt.u32.totalorder %s3416_s15, %s4718_s0 }
 0x21a   : > { %p3418_p10 = pnand %p3417_p2, %p4977_p6 }
 0x21b   : > { %p3423_p5 = por %p3422_p9, %p3421_p4 }
 0x21c   : > { %p3419_p3 = pneg %p3418_p10 }
 0x21d   : > { %p3425_p12 = por %p3424_p7, %p3423_p5 }
 0x21f   : > { %p3426_p1 = pnand %p3425_p12, %p3419_p3 }
 0x221   : > { %3429 = shalt.err (!%p3426_p1)
}
 0x222   : > { %3099 = dma.vmem_to_hbm [thread:$0]  (%p4977_p6), %s4720_s21, 2048, %s4718_s0, %s4755_s23, %s3543_s27, %s3543_s27, %s3544_s3   ;;  %v2879_v40 = vcombine.low %v4743_v34, %v4743_v34  ;;  %v2880_v43 = vcombine.high %v4743_v34, %v4743_v34  ;;  %v2883_v12 = vcombine.low %v4747_v3, %v4747_v3  ;;  %v2884_v29 = vcombine.high %v4747_v3, %v4747_v3 }
 0x223   : > { %2307 = vst.msk [vmem:[%s4507_s18 + $0x40] sm:$0xf] %vm1250_vm1, %v2877_v4  ;;  %2308 = vst.msk [vmem:[%s4507_s18 + $0x44] sm:$0xf] %vm1250_vm1, %v2878_v17  ;;  %v2885_v18 = vcombine.low %v4732_v36, %v4732_v36  ;;  %v2886_v51 = vcombine.high %v4732_v36, %v4732_v36  ;;  %v2887_v63 = vcombine.low %v2188_v45, %v2188_v45  ;;  %s4857_s23 = scalar_lea.hbm %s4938_s7, %s4518_s10  ;;  %s2339_s10 = scalar_lea.sflag [#allocation15], %s3824_s26 }
 0x224   : > { %v2888_v13 = vcombine.high %v2188_v45, %v2188_v45  ;;  %2311 = vst.msk [vmem:[%s4507_s18 + $0x50] sm:$0xf] %vm1250_vm1, %v2881_v27  ;;  %2312 = vst.msk [vmem:[%s4507_s18 + $0x54] sm:$0xf] %vm1250_vm1, %v2882_v15  ;;  %v2889_v30 = vcombine.low %v4737_v46, %v4737_v46  ;;  %v2890_v28 = vcombine.high %v4737_v46, %v4737_v46  ;;  %s3430_s14 = scalar_lea.vmem %s4861_s13, 2048  ;;  %s3547_s28 = smov [#allocation14]  }
 0x225   : > { %v2891_v10 = vcombine.low %v2194_v41, %v2194_v41  ;;  %v2892_v50 = vcombine.high %v2194_v41, %v2194_v41  ;;  %2309 = vst.msk [vmem:[%s4507_s18 + $0x48] sm:$0xf] %vm1250_vm1, %v2879_v40  ;;  %2310 = vst.msk [vmem:[%s4507_s18 + $0x4c] sm:$0xf] %vm1250_vm1, %v2880_v43  ;;  %p3431_p8 = scmp.ne.s32.totalorder %s4861_s13, %s3430_s14  ;;  %s3434_s16 = sshll.u32 %s3547_s28, 4  ;;  %s3435_s16 = int_to_ptr.vmem [resolvable:$false] %s3434_s16 }
 0x226   : > { %2313 = vst.msk [vmem:[%s4507_s18 + $0x58] sm:$0xf] %vm1250_vm1, %v2883_v12  ;;  %2314 = vst.msk [vmem:[%s4507_s18 + $0x5c] sm:$0xf] %vm1250_vm1, %v2884_v29  ;;  %s3436_s8 = scalar_lea.vmem %s3435_s16, 4096  ;;  %p3437_p0 = scmp.lt.s32.totalorder %s4861_s13, %s3435_s16 }
 0x227   : > { %2315 = vst.msk [vmem:[%s4507_s18 + $0x60] sm:$0xf] %vm1250_vm1, %v2885_v18  ;;  %2316 = vst.msk [vmem:[%s4507_s18 + $0x64] sm:$0xf] %vm1250_vm1, %v2886_v51  ;;  %p3432_p11 = pnand %p3431_p8, %p4977_p6  ;;  %p3438_p2 = scmp.lt.s32.totalorder %s3436_s8, %s3430_s14 }
 0x228   : > { %2317 = vst.msk [vmem:[%s4507_s18 + $0x68] sm:$0xf] %vm1250_vm1, %v2887_v63  ;;  %2318 = vst.msk [vmem:[%s4507_s18 + $0x6c] sm:$0xf] %vm1250_vm1, %v2888_v13 }
 0x229   : > { %2319 = vst.msk [vmem:[%s4507_s18 + $0x70] sm:$0xf] %vm1250_vm1, %v2889_v30  ;;  %2320 = vst.msk [vmem:[%s4507_s18 + $0x74] sm:$0xf] %vm1250_vm1, %v2890_v28  ;;  %p3433_p13 = pneg %p3432_p11  ;;  %p3439_p10 = por %p3438_p2, %p3437_p0 }
 0x22a   : > { %2321 = vst.msk [vmem:[%s4507_s18 + $0x78] sm:$0xf] %vm1250_vm1, %v2891_v10  ;;  %2322 = vst.msk [vmem:[%s4507_s18 + $0x7c] sm:$0xf] %vm1250_vm1, %v2892_v50 }
 0x22b   : > { %p3440_p3 = pnand %p3439_p10, %p3433_p13 }
 0x22d   : > { %3443 = shalt.err (!%p3440_p3)
}
 0x22e   : > { %s3444_s18 = scalar_lea.hbm %s4857_s23, 2048  ;;  %s3448_s17 = scalar_lea.hbm %s4938_s7, 4096 }
 0x22f   : > { %p3445_p4 = scmp.ne.s32.totalorder %s4857_s23, %s3444_s18  ;;  %p3449_p7 = scmp.lt.u32.totalorder %s4857_s23, %s4938_s7 }
 0x230   : > { %p3450_p12 = scmp.lt.u32.totalorder %s3448_s17, %s3444_s18  ;;  %p3452_p8 = scmp.lt.u32.totalorder %s3444_s18, %s4857_s23 }
 0x231   : > { %p3446_p9 = pnand %p3445_p4, %p4977_p6 }
 0x232   : > { %p3451_p1 = por %p3450_p12, %p3449_p7 }
 0x233   : > { %p3447_p5 = pneg %p3446_p9 }
 0x234   : > { %p3453_p11 = por %p3452_p8, %p3451_p1 }
 0x236   : > { %p3454_p13 = pnand %p3453_p11, %p3447_p5 }
 0x238   : > { %3457 = shalt.err (!%p3454_p13)
}
 0x239   : > { %3100 = dma.vmem_to_hbm [thread:$0]  (%p4977_p6), %s4861_s13, 2048, %s4857_s23, %s2339_s10, %s3543_s27, %s3543_s27, %s3544_s3  }
 0x23a PF: > { %s4984_s2 = sld [smem:[#allocation25_spill]]  ;;  %s2425_s30 = sand.u32 1, %s3512_s24  }
 0x23b   : > { %p4986_p2 = scmp.ge.s32.totalorder %s3532_s29, 2  ;;  %s2426_s11 = scalar_lea.sflag [#allocation4], %s2425_s30 }
 0x240   : > { %p4985_p0 = scmp.ne.s32.totalorder %s4984_s2, 0 }
 0x242   : > { %p3120_p10 = pnand %p4986_p2, %p4985_p0 }
 0x244   : > { %3499 = dma.done.wait (!%p3120_p10), %s2426_s11, 2048  }
 0x245   : > { %3501 = vsyncadd (!%p3120_p10), %s2426_s11, 4294965248  ;;  %s4987_s19 = sadd.s32 4294967294, %s3532_s29  }
 0x246   : > { %s2434_s9 = sand.u32 1, %s4987_s19  }
 0x247   : > { %s2435_s21 = scalar_lea.sflag [#allocation12], %s2434_s9 }
 0x248   : > { %3503 = dma.done.wait (!%p3120_p10), %s2435_s21, 4096  }
 0x249   : > { %3505 = vsyncadd (!%p3120_p10), %s2435_s21, 4294963200  ;;  %s2453_s26 = scalar_lea.sflag [#allocation15], %s2425_s30 }
 0x24a   : > { %3507 = dma.done.wait (!%p3120_p10), %s2453_s26, 2048  }
 0x24b   : > { %3509 = vsyncadd (!%p3120_p10), %s2453_s26, 4294965248  ;;  %s34_s29 = sadd.s32 1, %s3532_s29   ;;  %s4988_s27 = sld [smem:[#allocation23_spill]] }
 0x24c   : > { %p31_p6 = scmp.ge.s32.totalorder %s34_s29, 4   ;;  %s4989_s26 = sld [smem:[#allocation27_spill]] }
 0x24d   : > { %s4990_s3 = sld [smem:[#allocation24_spill]]  ;;  %s4991_s28 = sld [smem:[#allocation26_spill]] }
 0x24e   : > { %s4992_s24 = smov %s3516_s25  ;;  %33 = sbr.rel (!%p31_p6) target bundleno = 17 (0x11), region = 151 }
 0x251   : > { %s4993_s25 = smov %s4988_s27 }
 0x253   : > { %s4994_s27 = smov %s4990_s3 }
 0x255   :  { %2458 = vsyncpa [#allocation3], 1 }
 0x256   :  { %2460 = vsyncpa [#allocation3 + $0x1], 1 }
 0x257   :  { %2461 = vsyncpa [#allocation6], 1 }
 0x258   :  { %2463 = vsyncpa [#allocation6 + $0x1], 1 }
 0x259   :  { %2464 = vsyncpa [#allocation9], 1 }
 0x25a   :  { %2465 = vsyncpa [#allocation4], 1 }
 0x25b   :  { %2467 = vsyncpa [#allocation4 + $0x1], 1 }
 0x25c   :  { %2468 = vsyncpa [#allocation12], 1 }
 0x25d   :  { %2470 = vsyncpa [#allocation12 + $0x1], 1 }
 0x25e   :  { %2471 = vsyncpa [#allocation15], 1 }
 0x25f   :  { %2473 = vsyncpa [#allocation15 + $0x1], 1 }

</bundles_post_ra>
